<compile_context>
chip_gen: v7x
topology: tpu7x:2x2x1
jax: 0.10.0
libtpu: 0.0.40
codegen_flags: <defaults>
</compile_context>

<pallas_src>
import functools

import jax
import jax.numpy as jnp
from jax.experimental import pallas as pl
from jax.experimental.pallas import tpu as pltpu


def round_up(x, m):
    return (x + m - 1) // m * m


def cdiv(a, b):
    return (a + b - 1) // b


# ----------------------------------------------------------------------------
# Pallas kernel 1: tiled matmul with fused bias epilogue (bf16 in, f32 acc)
# ----------------------------------------------------------------------------
def _mm_kernel(a_ref, b_ref, bias_ref, o_ref, acc_ref):
    @pl.when(pl.program_id(2) == 0)
    def _():
        acc_ref[...] = jnp.zeros_like(acc_ref)

    acc_ref[...] += jnp.dot(a_ref[...], b_ref[...],
                            preferred_element_type=jnp.float32)

    @pl.when(pl.program_id(2) == pl.num_programs(2) - 1)
    def _():
        o_ref[...] = acc_ref[...] + bias_ref[...]


def _pick_k_tile(K):
    Ka = round_up(K, 128)
    best = 128
    t = 128
    while t <= min(512, Ka):
        if Ka % t == 0:
            best = t
        t += 128
    return best


@functools.lru_cache(maxsize=None)
def _build_matmul(Mp, Kp, Np, tm, tk, tn):
    grid_spec = pltpu.PrefetchScalarGridSpec(
        num_scalar_prefetch=0,
        grid=(Mp // tm, Np // tn, Kp // tk),
        in_specs=[pl.BlockSpec((tm, tk), lambda i, j, kb: (i, kb)),
                  pl.BlockSpec((tk, tn), lambda i, j, kb: (kb, j)),
                  pl.BlockSpec((1, tn), lambda i, j, kb: (0, j))],
        out_specs=pl.BlockSpec((tm, tn), lambda i, j, kb: (i, j)),
        scratch_shapes=[pltpu.VMEM((tm, tn), jnp.float32)])
    fn = pl.pallas_call(
        _mm_kernel,
        out_shape=jax.ShapeDtypeStruct((Mp, Np), jnp.float32),
        grid_spec=grid_spec,
        compiler_params=pltpu.CompilerParams(
            dimension_semantics=("parallel", "parallel", "arbitrary")))
    return jax.jit(fn)


def matmul_bias(a, w, bias=None):
    """(M, K) @ (K, N) + bias -> (M, N) f32.  bf16 MXU inputs, f32 accumulation."""
    M, K = a.shape
    N = w.shape[1]
    a16 = a.astype(jnp.bfloat16)
    w16 = w.astype(jnp.bfloat16)
    # Lane-sparse / tiny GEMMs (Cout < 64, few voxels): XLA dot, don't pad N to 128.
    if M < 128 or N < 64:
        y = jnp.dot(a16, w16, preferred_element_type=jnp.float32)
        if bias is not None:
            y = y + bias[None, :].astype(jnp.float32)
        return y
    tm = 512 if M >= 512 else (256 if M >= 256 else round_up(M, 8))
    tn = 256 if N >= 256 else round_up(N, 128)
    tk = _pick_k_tile(K)
    Mp, Kp, Np = round_up(M, tm), round_up(K, tk), round_up(N, tn)
    if (Mp, Kp) != (M, K):
        a16 = jnp.pad(a16, ((0, Mp - M), (0, Kp - K)))
    if (Kp, Np) != (K, N):
        w16 = jnp.pad(w16, ((0, Kp - K), (0, Np - N)))
    b = bias if bias is not None else jnp.zeros((N,), jnp.float32)
    bp = jnp.pad(b.astype(jnp.float32), (0, Np - N)).reshape(1, Np)
    out = _build_matmul(Mp, Kp, Np, tm, tk, tn)(a16, w16, bp)
    return out[:M, :N]


# ----------------------------------------------------------------------------
# Pallas kernel 2: k^3 stride-1 conv as in-kernel tap-shifted GEMM accumulation.
# Each tap is a contiguous row window of the flattened, spatially padded
# channels-last input; the window is fetched by manual, double-buffered DMA
# (prefetch tap t+1 while computing tap t).  No im2col materialization.
# ----------------------------------------------------------------------------
def _conv_tap_kernel(x_hbm, w_ref, bias_ref, o_ref, a_buf, sem, acc_ref,
                     *, tm, k, P2, P3, rmax):
    i = pl.program_id(0)
    tap = pl.program_id(2)
    T = pl.num_programs(2)
    kk = k * k

    def row_for(t):
        t1 = t // kk
        r = t - t1 * kk
        t2 = r // k
        t3 = r - t2 * k
        shift = (t1 * P2 + t2) * P3 + t3
        # Element-level row offset -> not expressible via BlockSpec; DMA it manually.
        return jnp.minimum(i * tm + shift, rmax)

    slot = tap % 2

    @pl.when(tap == 0)
    def _():
        acc_ref[...] = jnp.zeros_like(acc_ref)
        pltpu.make_async_copy(x_hbm.at[pl.ds(row_for(0), tm), :],
                              a_buf.at[0], sem.at[0]).start()

    # Wait for the current tap's A window.
    pltpu.make_async_copy(x_hbm.at[pl.ds(0, tm), :],
                          a_buf.at[slot], sem.at[slot]).wait()

    # Prefetch the next tap's window into the other slot (overlaps with the dot).
    @pl.when(tap + 1 < T)
    def _():
        pltpu.make_async_copy(x_hbm.at[pl.ds(row_for(tap + 1), tm), :],
                              a_buf.at[1 - slot], sem.at[1 - slot]).start()

    acc_ref[...] += jnp.dot(a_buf[slot], w_ref[0],
                            preferred_element_type=jnp.float32)

    @pl.when(tap == T - 1)
    def _():
        o_ref[...] = acc_ref[...] + bias_ref[...]


@functools.lru_cache(maxsize=None)
def _build_conv_tap(Rtot, Kp, Np, T, Mout, tm, tn, k, P2, P3):
    kern = functools.partial(_conv_tap_kernel, tm=tm, k=k, P2=P2, P3=P3,
                             rmax=Rtot - tm)
    grid_spec = pltpu.PrefetchScalarGridSpec(
        num_scalar_prefetch=0,
        grid=(Mout // tm, Np // tn, T),
        in_specs=[pl.BlockSpec(memory_space=pl.ANY),                      # x (HBM, flat)
                  pl.BlockSpec((1, Kp, tn), lambda i, j, t: (t, 0, j)),   # weights
                  pl.BlockSpec((1, tn), lambda i, j, t: (0, j))],         # bias
        out_specs=pl.BlockSpec((tm, tn), lambda i, j, t: (i, j)),
        scratch_shapes=[pltpu.VMEM((2, tm, Kp), jnp.bfloat16),
                        pltpu.SemaphoreType.DMA((2,)),
                        pltpu.VMEM((tm, tn), jnp.float32)])
    fn = pl.pallas_call(
        kern,
        out_shape=jax.ShapeDtypeStruct((Mout, Np), jnp.float32),
        grid_spec=grid_spec,
        compiler_params=pltpu.CompilerParams(
            dimension_semantics=("parallel", "parallel", "arbitrary")))
    return jax.jit(fn)


def conv3d_tap(x, w, bias, k, pad):
    """Stride-1 k^3 conv, channels-last x: (B,S1,S2,S3,Cin), torch OIDHW weight."""
    B, S1, S2, S3, Cin = x.shape
    Cout = w.shape[0]
    O1, O2, O3 = S1, S2, S3                       # same padding, stride 1
    P2, P3 = S2 + 2 * pad, S3 + 2 * pad
    plane = P2 * P3
    T = k * k * k
    Kp = round_up(Cin, 128)
    tn = 256 if Cout >= 256 else round_up(Cout, 128)
    Np = round_up(Cout, tn)
    max_shift = (k - 1) * (plane + P3 + 1)
    m_est = B * (S1 + 2 * pad) * plane
    tm = 512 if m_est >= 512 else (256 if m_est >= 256 else round_up(m_est, 8))
    # Extra trailing planes so every tap-shifted row window stays in bounds.
    extra = cdiv(tm + max_shift, plane)
    P1 = S1 + 2 * pad + extra
    Rtot = B * P1 * plane
    Mout = round_up(Rtot, tm)

    x16 = x.astype(jnp.bfloat16)
    xp = jnp.pad(x16, ((0, 0), (pad, pad + extra), (pad, pad), (pad, pad),
                       (0, Kp - Cin)))
    xflat = xp.reshape(Rtot, Kp)

    wt = jnp.transpose(w, (2, 3, 4, 1, 0)).reshape(T, Cin, Cout)
    wt = jnp.pad(wt, ((0, 0), (0, Kp - Cin), (0, Np - Cout))).astype(jnp.bfloat16)

    b = bias if bias is not None else jnp.zeros((Cout,), jnp.float32)
    bp = jnp.pad(b.astype(jnp.float32), (0, Np - Cout)).reshape(1, Np)

    out = _build_conv_tap(Rtot, Kp, Np, T, Mout, tm, tn, k, P2, P3)(xflat, wt, bp)
    y = out[:Rtot].reshape(B, P1, P2, P3, Np)[:, :O1, :O2, :O3, :Cout]
    return y


# ----------------------------------------------------------------------------
# Conv3d dispatcher (channels-last, PyTorch conv semantics)
# ----------------------------------------------------------------------------
def conv3d_cl(x, w, b=None, stride=1, padding=0):
    B, S1, S2, S3, Cin = x.shape
    Cout, _, k, _, _ = w.shape

    if k == 1:                                    # 1x1x1 -> direct lane-dense GEMM
        xs = x if stride == 1 else x[:, ::stride, ::stride, ::stride, :]
        _, O1, O2, O3, _ = xs.shape
        a = xs.reshape(B * O1 * O2 * O3, Cin)
        wm = w.reshape(Cout, Cin).T
        y = matmul_bias(a, wm, b)
        return y.reshape(B, O1, O2, O3, Cout)

    if (stride == 1 and 64 <= Cin <= 512 and Cout >= 64
            and B * S1 * S2 * S3 >= 512):
        return conv3d_tap(x, w, b, k, padding)

    # Fallback (stride-2 3x3 convs, small-channel convs): im2col in bf16 + GEMM.
    x16 = x.astype(jnp.bfloat16)
    xp = jnp.pad(x16, ((0, 0), (padding, padding), (padding, padding),
                       (padding, padding), (0, 0)))

    def odim(S):
        return (S + 2 * padding - k) // stride + 1

    O1, O2, O3 = odim(S1), odim(S2), odim(S3)

    def taps(O):
        return jnp.arange(O)[:, None] * stride + jnp.arange(k)[None, :]

    p = jnp.take(xp, taps(O1), axis=1)            # (B,O1,k,P2,P3,C)
    p = jnp.take(p, taps(O2), axis=3)             # (B,O1,k,O2,k,P3,C)
    p = jnp.take(p, taps(O3), axis=5)             # (B,O1,k,O2,k,O3,k,C)
    a = jnp.transpose(p, (0, 1, 3, 5, 2, 4, 6, 7)).reshape(
        B * O1 * O2 * O3, k * k * k * Cin)
    wm = jnp.transpose(w, (2, 3, 4, 1, 0)).reshape(k * k * k * Cin, Cout)
    y = matmul_bias(a, wm, b)
    return y.reshape(B, O1, O2, O3, Cout)


# ----------------------------------------------------------------------------
# Pallas kernels 3+4: InstanceNorm3d (affine=False, eps=1e-5), chunked two-pass.
# Apply pass optionally fuses a residual add (+ ReLU) — used for the ResNet
# bottleneck `relu(out + identity)` epilogue.
# ----------------------------------------------------------------------------
def _in_stats_kernel(x_ref, s_ref, ss_ref):
    @pl.when(pl.program_id(1) == 0)
    def _():
        s_ref[...] = jnp.zeros_like(s_ref)
        ss_ref[...] = jnp.zeros_like(ss_ref)
    x = x_ref[...].astype(jnp.float32)
    s_ref[...] += jnp.sum(x, axis=1, keepdims=True)
    ss_ref[...] += jnp.sum(x * x, axis=1, keepdims=True)


def _in_apply_kernel(x_ref, mean_ref, rstd_ref, o_ref, *, relu):
    y = (x_ref[...].astype(jnp.float32) - mean_ref[...]) * rstd_ref[...]
    if relu:
        y = jnp.maximum(y, 0.0)
    o_ref[...] = y


def _in_apply_res_kernel(x_ref, res_ref, mean_ref, rstd_ref, o_ref, *, relu):
    y = (x_ref[...].astype(jnp.float32) - mean_ref[...]) * rstd_ref[...]
    y = y + res_ref[...].astype(jnp.float32)
    if relu:
        y = jnp.maximum(y, 0.0)
    o_ref[...] = y


@functools.lru_cache(maxsize=None)
def _build_in_stats(B, V, C, vc):
    fn = pl.pallas_call(
        _in_stats_kernel,
        out_shape=(jax.ShapeDtypeStruct((B, 1, C), jnp.float32),
                   jax.ShapeDtypeStruct((B, 1, C), jnp.float32)),
        grid=(B, V // vc),
        in_specs=[pl.BlockSpec((1, vc, C), lambda b, v: (b, v, 0))],
        out_specs=(pl.BlockSpec((1, 1, C), lambda b, v: (b, 0, 0)),
                   pl.BlockSpec((1, 1, C), lambda b, v: (b, 0, 0))),
        compiler_params=pltpu.CompilerParams(
            dimension_semantics=("parallel", "arbitrary")))
    return jax.jit(fn)


@functools.lru_cache(maxsize=None)
def _build_in_apply(B, V, C, vc, relu):
    kern = functools.partial(_in_apply_kernel, relu=relu)
    fn = pl.pallas_call(
        kern,
        out_shape=jax.ShapeDtypeStruct((B, V, C), jnp.float32),
        grid=(B, V // vc),
        in_specs=[pl.BlockSpec((1, vc, C), lambda b, v: (b, v, 0)),
                  pl.BlockSpec((1, 1, C), lambda b, v: (b, 0, 0)),
                  pl.BlockSpec((1, 1, C), lambda b, v: (b, 0, 0))],
        out_specs=pl.BlockSpec((1, vc, C), lambda b, v: (b, v, 0)),
        compiler_params=pltpu.CompilerParams(
            dimension_semantics=("parallel", "parallel")))
    return jax.jit(fn)


@functools.lru_cache(maxsize=None)
def _build_in_apply_res(B, V, C, vc, relu):
    kern = functools.partial(_in_apply_res_kernel, relu=relu)
    fn = pl.pallas_call(
        kern,
        out_shape=jax.ShapeDtypeStruct((B, V, C), jnp.float32),
        grid=(B, V // vc),
        in_specs=[pl.BlockSpec((1, vc, C), lambda b, v: (b, v, 0)),
                  pl.BlockSpec((1, vc, C), lambda b, v: (b, v, 0)),
                  pl.BlockSpec((1, 1, C), lambda b, v: (b, 0, 0)),
                  pl.BlockSpec((1, 1, C), lambda b, v: (b, 0, 0))],
        out_specs=pl.BlockSpec((1, vc, C), lambda b, v: (b, v, 0)),
        compiler_params=pltpu.CompilerParams(
            dimension_semantics=("parallel", "parallel")))
    return jax.jit(fn)


def _pick_vchunk(V, C):
    target = max(8, (512 * 1024) // max(C, 1))    # keep blocks well under VMEM limits
    v = V
    while v > target and v % 2 == 0:
        v //= 2
    if v != V and v % 8 != 0:
        v = V
    return v


def instance_norm(x, relu=False, eps=1e-5, residual=None):
    # x: (B, S1, S2, S3, C) channels-last; normalize each (b, c) over the volume.
    # If residual is given, computes relu?(IN(x) + residual) in a single apply pass.
    B, S1, S2, S3, C = x.shape
    V = S1 * S2 * S3
    xr = x.reshape(B, V, C).astype(jnp.float32)
    vc = _pick_vchunk(V, C)
    s, ss = _build_in_stats(B, V, C, vc)(xr)
    mean = s / V
    var = jnp.maximum(ss / V - mean * mean, 0.0)  # f32 stats (precision-safe)
    rstd = jax.lax.rsqrt(var + eps)
    if residual is None:
        y = _build_in_apply(B, V, C, vc, bool(relu))(xr, mean, rstd)
    else:
        rr = residual.reshape(B, V, C).astype(jnp.float32)
        y = _build_in_apply_res(B, V, C, vc, bool(relu))(xr, rr, mean, rstd)
    return y.reshape(x.shape)


# ----------------------------------------------------------------------------
# Pooling / upsampling glue (channels-last, plain jnp)
# ----------------------------------------------------------------------------
def maxpool3d_k3s2p1(x):
    neg = jnp.finfo(x.dtype).min
    xp = jnp.pad(x, ((0, 0), (1, 1), (1, 1), (1, 1), (0, 0)), constant_values=neg)

    def odim(S):
        return (S + 2 - 3) // 2 + 1

    def taps(O):
        return jnp.arange(O)[:, None] * 2 + jnp.arange(3)[None, :]

    O1, O2, O3 = odim(x.shape[1]), odim(x.shape[2]), odim(x.shape[3])
    p = jnp.take(xp, taps(O1), axis=1)
    p = jnp.take(p, taps(O2), axis=3)
    p = jnp.take(p, taps(O3), axis=5)
    return p.max(axis=(2, 4, 6))


def maxpool3d_k2s2(x):
    B, S1, S2, S3, C = x.shape
    return x.reshape(B, S1 // 2, 2, S2 // 2, 2, S3 // 2, 2, C).max(axis=(2, 4, 6))


def upsample2(x):  # F.interpolate(scale_factor=2), default 'nearest'
    x = jnp.repeat(x, 2, axis=1)
    x = jnp.repeat(x, 2, axis=2)
    return jnp.repeat(x, 2, axis=3)


# ----------------------------------------------------------------------------
# Deterministic parameter init (PyTorch weight layouts: OIDHW)
# ----------------------------------------------------------------------------
class KeyGen:
    def __init__(self, key):
        self.key = key
        self.i = 0

    def __call__(self):
        self.i += 1
        return jax.random.fold_in(self.key, self.i)


def init_conv(key, cin, cout, k, bias=True):
    kw, kb = jax.random.split(key)
    fan_in = cin * k * k * k
    w = jax.random.normal(kw, (cout, cin, k, k, k), jnp.float32) * jnp.sqrt(2.0 / fan_in)
    b = jax.random.normal(kb, (cout,), jnp.float32) * 0.01 if bias else None
    return (w, b)


def init_bottleneck(kg, inplanes, planes, stride, downsample):
    p = {
        'conv1': init_conv(kg(), inplanes, planes, 1, False),
        'conv2': init_conv(kg(), planes, planes, 3, False),
        'conv3': init_conv(kg(), planes, planes * 4, 1, False),
        'stride': stride,
    }
    if downsample:
        p['ds'] = init_conv(kg(), inplanes, planes * 4, 1, False)
    return p


def init_layer(kg, inplanes, planes, blocks, stride):
    layers = []
    downsample = (stride != 1) or (inplanes != planes * 4)
    layers.append(init_bottleneck(kg, inplanes, planes, stride, downsample))
    inplanes = planes * 4
    for _ in range(1, blocks):
        layers.append(init_bottleneck(kg, inplanes, planes, 1, False))
    return layers, inplanes


def init_resnet(kg, ch_in):
    p = {'conv1': init_conv(kg(), ch_in, 64, 7, False)}
    inplanes = 64
    p['layer1'], inplanes = init_layer(kg, inplanes, 64, 3, 1)
    p['layer2'], inplanes = init_layer(kg, inplanes, 128, 4, 2)
    p['layer3'], inplanes = init_layer(kg, inplanes, 256, 6, 2)
    p['layer4'], inplanes = init_layer(kg, inplanes, 512, 3, 2)
    return p


def bottleneck_fwd(p, x):
    out = conv3d_cl(x, p['conv1'][0], None, stride=1, padding=0)
    out = instance_norm(out, relu=True)
    out = conv3d_cl(out, p['conv2'][0], None, stride=p['stride'], padding=1)
    out = instance_norm(out, relu=True)
    out = conv3d_cl(out, p['conv3'][0], None, stride=1, padding=0)
    if 'ds' in p:
        idn = conv3d_cl(x, p['ds'][0], None, stride=p['stride'], padding=0)
        idn = instance_norm(idn, relu=False)
    else:
        idn = x
    # relu(IN(out) + identity), with the add + ReLU fused into the apply pass.
    return instance_norm(out, relu=True, residual=idn)


def resnet_features(p, x):
    x1 = conv3d_cl(x, p['conv1'][0], None, stride=1, padding=3)
    x1 = instance_norm(x1, relu=True)
    x2 = maxpool3d_k3s2p1(x1)
    for bp in p['layer1']:
        x2 = bottleneck_fwd(bp, x2)
    x3 = x2
    for bp in p['layer2']:
        x3 = bottleneck_fwd(bp, x3)
    x4 = x3
    for bp in p['layer3']:
        x4 = bottleneck_fwd(bp, x4)
    x5 = x4
    for bp in p['layer4']:
        x5 = bottleneck_fwd(bp, x5)
    return x1, x2, x3, x4, x5


# ---- MTA block ----
def init_mta(kg, ch):
    return {
        'convC': init_conv(kg(), 2, 1, 7, True),
        'convH': init_conv(kg(), 2, 1, 7, True),
        'convW': init_conv(kg(), 2, 1, 7, True),  # present but unused (as in original)
        'convD': init_conv(kg(), 2, 1, 7, True),
        'bottleneck': init_conv(kg(), ch * 4, ch, 1, True),
    }


def mta_fwd(p, x):
    # x: (B, H, W, D, C) channels-last
    def attn_conv(z, conv_p):
        a = conv3d_cl(z, conv_p[0], conv_p[1], stride=1, padding=3)
        return instance_norm(a, relu=False)

    # channel attention: pool over C, 2-channel volume (H, W, D)
    z = jnp.stack([jnp.mean(x, axis=-1), jnp.max(x, axis=-1)], axis=-1)
    a_c = attn_conv(z, p['convC'])                                   # (B,H,W,D,1)
    x_c = x * jax.nn.sigmoid(a_c)

    # H attention: pool over H, volume (C, W, D)
    za = jnp.transpose(jnp.mean(x, axis=1), (0, 3, 1, 2))
    zm = jnp.transpose(jnp.max(x, axis=1), (0, 3, 1, 2))
    a_h = attn_conv(jnp.stack([za, zm], axis=-1), p['convH'])[..., 0]  # (B,C,W,D)
    g_h = jax.nn.sigmoid(a_h).transpose(0, 2, 3, 1)[:, None]           # (B,1,W,D,C)
    x_h = x * g_h

    # W attention (re-uses ConvH, faithful to the original code): volume (C, H, D)
    za = jnp.transpose(jnp.mean(x, axis=2), (0, 3, 1, 2))
    zm = jnp.transpose(jnp.max(x, axis=2), (0, 3, 1, 2))
    a_w = attn_conv(jnp.stack([za, zm], axis=-1), p['convH'])[..., 0]  # (B,C,H,D)
    g_w = jax.nn.sigmoid(a_w).transpose(0, 2, 3, 1)[:, :, None]        # (B,H,1,D,C)
    x_w = x * g_w

    # D attention: pool over D, volume (C, H, W)
    za = jnp.transpose(jnp.mean(x, axis=3), (0, 3, 1, 2))
    zm = jnp.transpose(jnp.max(x, axis=3), (0, 3, 1, 2))
    a_d = attn_conv(jnp.stack([za, zm], axis=-1), p['convD'])[..., 0]  # (B,C,H,W)
    g_d = jax.nn.sigmoid(a_d).transpose(0, 2, 3, 1)[:, :, :, None]     # (B,H,W,1,C)
    x_d = x * g_d

    xo = jnp.concatenate([x_c, x_h, x_w, x_d], axis=-1)
    xo = conv3d_cl(xo, p['bottleneck'][0], p['bottleneck'][1], stride=1, padding=0)
    return instance_norm(xo, relu=True)


# ---- conv_block / RCB ----
def init_conv_block(kg, cin, cout):
    return {'c1': init_conv(kg(), cin, cout, 3, True),
            'c2': init_conv(kg(), cout, cout, 3, True)}


def conv_block_fwd(p, x):
    x = conv3d_cl(x, p['c1'][0], p['c1'][1], stride=1, padding=1)
    x = instance_norm(x, relu=True)
    x = conv3d_cl(x, p['c2'][0], p['c2'][1], stride=1, padding=1)
    x = instance_norm(x, relu=True)
    return x


def init_rcb(kg, cin, cout):
    return {'conv0': init_conv_block(kg, cin, cout),
            'expand': init_conv(kg(), cin, cout, 1, True)}


def rcb_fwd(p, x):
    a = conv_block_fwd(p['conv0'], x)
    b = conv3d_cl(x, p['expand'][0], p['expand'][1], stride=1, padding=0)
    b = instance_norm(b, relu=True)
    return a + b


def cbr(p, z):  # 1x1x1 conv + InstanceNorm + ReLU
    z = conv3d_cl(z, p[0], p[1], stride=1, padding=0)
    return instance_norm(z, relu=True)


# ---- full LiSegPNet ----
def init_lisegpnet(key, img_ch=3, output_ch=1, base_ch=8):
    kg = KeyGen(key)
    P = {'resnet': init_resnet(kg, img_ch)}
    ch_list = [64, 256, 512, 1024, 2048]
    P['rcb_e1_pre'] = init_conv(kg(), img_ch + ch_list[0], base_ch, 1, True)
    P['rcb_e1'] = init_rcb(kg, base_ch, base_ch)
    P['mta_e1'] = init_mta(kg, base_ch)
    P['rcb_e2_pre'] = init_conv(kg(), base_ch + ch_list[1], base_ch * 2, 1, True)
    P['rcb_e2'] = init_rcb(kg, base_ch * 2, base_ch * 2)
    P['mta_e2'] = init_mta(kg, base_ch * 2)
    P['rcb_e3_pre'] = init_conv(kg(), base_ch * 2 + ch_list[2], base_ch * 4, 1, True)
    P['rcb_e3'] = init_rcb(kg, base_ch * 4, base_ch * 4)
    P['mta_e3'] = init_mta(kg, base_ch * 4)
    P['rcb_e4_pre'] = init_conv(kg(), base_ch * 4 + ch_list[3], base_ch * 8, 1, True)
    P['rcb_e4'] = init_rcb(kg, base_ch * 8, base_ch * 8)
    P['mta_e4'] = init_mta(kg, base_ch * 8)
    P['bridge'] = init_conv(kg(), base_ch * 8 + ch_list[4], base_ch * 8, 1, True)
    P['ch_c1'] = init_conv(kg(), base_ch, base_ch, 1, True)
    P['mta_c1'] = init_mta(kg, base_ch)
    P['ch_c2'] = init_conv(kg(), base_ch * 2, base_ch * 2, 1, True)
    P['mta_c2'] = init_mta(kg, base_ch * 2)
    P['ch_c3'] = init_conv(kg(), base_ch * 4, base_ch * 4, 1, True)
    P['mta_c3'] = init_mta(kg, base_ch * 4)
    P['ch_c4'] = init_conv(kg(), base_ch * 8, base_ch * 8, 1, True)
    P['mta_c4'] = init_mta(kg, base_ch * 8)
    P['rcb_d1'] = init_rcb(kg, base_ch * 2, base_ch)
    P['rcb_d2'] = init_rcb(kg, base_ch * 4, base_ch)
    P['rcb_d3'] = init_rcb(kg, base_ch * 8, base_ch * 2)
    P['rcb_d4'] = init_rcb(kg, base_ch * 16, base_ch * 4)
    P['final'] = init_conv(kg(), base_ch, output_ch, 1, True)
    return P


def lisegpnet_forward(P, x, output_ch=1):
    # x arrives in PyTorch NCDHW layout; run the network channels-last internally.
    xl = jnp.transpose(x, (0, 2, 3, 4, 1))
    x_res1, x_res2, x_res3, x_res4, x_res5 = resnet_features(P['resnet'], xl)

    x_e1 = cbr(P['rcb_e1_pre'], jnp.concatenate([xl, x_res1], axis=-1))
    x_e1 = rcb_fwd(P['rcb_e1'], x_e1)

    x_e2 = mta_fwd(P['mta_e1'], x_e1)
    x_e2 = maxpool3d_k2s2(x_e2)
    x_e2 = cbr(P['rcb_e2_pre'], jnp.concatenate([x_e2, x_res2], axis=-1))
    x_e2 = rcb_fwd(P['rcb_e2'], x_e2)

    x_e3 = mta_fwd(P['mta_e2'], x_e2)
    x_e3 = maxpool3d_k2s2(x_e3)
    x_e3 = cbr(P['rcb_e3_pre'], jnp.concatenate([x_e3, x_res3], axis=-1))
    x_e3 = rcb_fwd(P['rcb_e3'], x_e3)

    x_e4 = mta_fwd(P['mta_e3'], x_e3)
    x_e4 = maxpool3d_k2s2(x_e4)
    x_e4 = cbr(P['rcb_e4_pre'], jnp.concatenate([x_e4, x_res4], axis=-1))
    x_e4 = rcb_fwd(P['rcb_e4'], x_e4)

    x_e5 = mta_fwd(P['mta_e4'], x_e4)
    x_e5 = maxpool3d_k2s2(x_e5)
    x_e5 = cbr(P['bridge'], jnp.concatenate([x_e5, x_res5], axis=-1))

    x_d5 = upsample2(x_e5)
    x_c4 = cbr(P['ch_c4'], x_e4)
    x_c4 = x_d5 + x_c4
    x_c4 = mta_fwd(P['mta_c4'], x_c4)
    x_d4 = rcb_fwd(P['rcb_d4'], jnp.concatenate([x_c4, x_d5], axis=-1))
    x_d4 = upsample2(x_d4)

    x_c3 = cbr(P['ch_c3'], x_e3)
    x_c3 = x_d4 + x_c3
    x_c3 = mta_fwd(P['mta_c3'], x_c3)
    x_d3 = rcb_fwd(P['rcb_d3'], jnp.concatenate([x_c3, x_d4], axis=-1))
    x_d3 = upsample2(x_d3)

    x_c2 = cbr(P['ch_c2'], x_e2)
    x_c2 = x_d3 + x_c2
    x_c2 = mta_fwd(P['mta_c2'], x_c2)
    x_d2 = rcb_fwd(P['rcb_d2'], jnp.concatenate([x_c2, x_d3], axis=-1))
    x_d2 = upsample2(x_d2)

    x_c1 = cbr(P['ch_c1'], x_e1)
    x_c1 = x_d2 + x_c1
    x_c1 = mta_fwd(P['mta_c1'], x_c1)
    x_d1 = rcb_fwd(P['rcb_d1'], jnp.concatenate([x_c1, x_d2], axis=-1))

    x_out = conv3d_cl(x_d1, P['final'][0], P['final'][1], stride=1, padding=0)
    if output_ch == 1:
        y = jax.nn.sigmoid(x_out)
    else:
        y = jax.nn.softmax(x_out, axis=-1)
    return jnp.transpose(y, (0, 4, 1, 2, 3))      # back to PyTorch NCDHW


if __name__ == "__main__":
    key = jax.random.PRNGKey(0)
    img_ch, output_ch, base_ch = 3, 1, 8
    B, S = 1, 16  # spatial must be divisible by 16 (4 encoder downsamples)

    params = init_lisegpnet(jax.random.fold_in(key, 123), img_ch, output_ch, base_ch)
    x = jax.random.normal(jax.random.fold_in(key, 7), (B, img_ch, S, S, S), jnp.float32)

    out = lisegpnet_forward(params, x, output_ch)
    out = jax.block_until_ready(out)

    assert out.shape == (B, output_ch, S, S, S), out.shape
    assert bool(jnp.all(jnp.isfinite(out)))
    print("KERNEL_OK")
</pallas_src>

<mosaic_0001>
module attributes {stable_mosaic.version = 11 : i64} {
  func.func @_mm_kernel(%arg0: i32, %arg1: i32, %arg2: i32, %arg3: memref<512x384xbf16, #tpu.memory_space<vmem>>, %arg4: memref<384x128xbf16, #tpu.memory_space<vmem>>, %arg5: memref<1x128xf32, #tpu.memory_space<vmem>>, %arg6: memref<512x128xf32, #tpu.memory_space<vmem>>, %arg7: memref<512x128xf32, #tpu.memory_space<vmem>>) attributes {dimension_semantics = [#tpu.dimension_semantics<parallel>, #tpu.dimension_semantics<parallel>, #tpu.dimension_semantics<arbitrary>], iteration_bounds = array<i64: 8, 1, 3>, scalar_prefetch = 0 : i64, scratch_operands = 1 : i64, tpu.core_type = #tpu.core_type<tc>, window_params = [{transform_indices = @transform_0, window_bounds = array<i64: 512, 384>}, {transform_indices = @transform_1, window_bounds = array<i64: 384, 128>}, {transform_indices = @transform_2, window_bounds = array<i64: 1, 128>}, {transform_indices = @transform_3, window_bounds = array<i64: 512, 128>}]} {
    %c0_i32 = arith.constant 0 : i32
    %0 = arith.cmpi eq, %arg2, %c0_i32 : i32
    %1 = arith.extui %0 : i1 to i32
    %c0_i32_0 = arith.constant 0 : i32
    %2 = arith.cmpi ne, %1, %c0_i32_0 : i32
    scf.if %2 {
      %cst_9 = arith.constant 0.000000e+00 : f32
      %12 = vector.broadcast %cst_9 : f32 to vector<512x128xf32>
      %c0_10 = arith.constant 0 : index
      %c0_11 = arith.constant 0 : index
      %13 = vector.load %arg7[%c0_10, %c0_11] : memref<512x128xf32, #tpu.memory_space<vmem>>, vector<512x128xf32>
      tpu.vector_store %arg7[%c0_10, %c0_11], %12 {strides = array<i32>} : memref<512x128xf32, #tpu.memory_space<vmem>>, vector<512x128xf32>,
    } else {
    }
    %c0 = arith.constant 0 : index
    %c0_1 = arith.constant 0 : index
    %3 = vector.load %arg7[%c0, %c0_1] : memref<512x128xf32, #tpu.memory_space<vmem>>, vector<512x128xf32>
    %c0_2 = arith.constant 0 : index
    %c0_3 = arith.constant 0 : index
    %4 = vector.load %arg3[%c0_2, %c0_3] : memref<512x384xbf16, #tpu.memory_space<vmem>>, vector<512x384xbf16>
    %c0_4 = arith.constant 0 : index
    %c0_5 = arith.constant 0 : index
    %5 = vector.load %arg4[%c0_4, %c0_5] : memref<384x128xbf16, #tpu.memory_space<vmem>>, vector<384x128xbf16>
    %cst = arith.constant dense<0.000000e+00> : vector<512x128xf32>
    %6 = tpu.matmul %4, %5, %cst {dimension_numbers = #tpu.dot_dimension_numbers<[1], [0], [0], [1], [0, 0, 1, 1], [], []>} : vector<512x384xbf16>, vector<384x128xbf16>, vector<512x128xf32> -> vector<512x128xf32>
    %7 = arith.addf %3, %6 : vector<512x128xf32>
    %c0_6 = arith.constant 0 : index
    %c0_7 = arith.constant 0 : index
    %8 = vector.load %arg7[%c0_6, %c0_7] : memref<512x128xf32, #tpu.memory_space<vmem>>, vector<512x128xf32>
    tpu.vector_store %arg7[%c0_6, %c0_7], %7 {strides = array<i32>} : memref<512x128xf32, #tpu.memory_space<vmem>>, vector<512x128xf32>,
    %c2_i32 = arith.constant 2 : i32
    %9 = arith.cmpi eq, %arg2, %c2_i32 : i32
    %10 = arith.extui %9 : i1 to i32
    %c0_i32_8 = arith.constant 0 : i32
    %11 = arith.cmpi ne, %10, %c0_i32_8 : i32
    scf.if %11 {
      %c0_9 = arith.constant 0 : index
      %c0_10 = arith.constant 0 : index
      %12 = vector.load %arg7[%c0_9, %c0_10] : memref<512x128xf32, #tpu.memory_space<vmem>>, vector<512x128xf32>
      %c0_11 = arith.constant 0 : index
      %c0_12 = arith.constant 0 : index
      %13 = vector.load %arg5[%c0_11, %c0_12] : memref<1x128xf32, #tpu.memory_space<vmem>>, vector<1x128xf32>
      %14 = vector.broadcast %13 : vector<1x128xf32> to vector<512x128xf32>
      %15 = arith.addf %12, %14 : vector<512x128xf32>
      %c0_13 = arith.constant 0 : index
      %c0_14 = arith.constant 0 : index
      %16 = vector.load %arg6[%c0_13, %c0_14] : memref<512x128xf32, #tpu.memory_space<vmem>>, vector<512x128xf32>
      tpu.vector_store %arg6[%c0_13, %c0_14], %15 {strides = array<i32>} : memref<512x128xf32, #tpu.memory_space<vmem>>, vector<512x128xf32>,
    } else {
    }
    return
  }
  func.func @transform_0(%arg0: i32, %arg1: i32, %arg2: i32) -> (i32, i32) {
    %c0_i32 = arith.constant 0 : i32
    return %arg0, %arg2 : i32, i32
  }
  func.func @transform_1(%arg0: i32, %arg1: i32, %arg2: i32) -> (i32, i32) {
    %c0_i32 = arith.constant 0 : i32
    return %arg2, %arg1 : i32, i32
  }
  func.func @transform_2(%arg0: i32, %arg1: i32, %arg2: i32) -> (i32, i32) {
    %c0_i32 = arith.constant 0 : i32
    %c0_i32_0 = arith.constant 0 : i32
    return %c0_i32, %arg1 : i32, i32
  }
  func.func @transform_3(%arg0: i32, %arg1: i32, %arg2: i32) -> (i32, i32) {
    %c0_i32 = arith.constant 0 : i32
    return %arg0, %arg1 : i32, i32
  }
}

</mosaic_0001>

<bundles_post_ra>
// kernel: tpu_custom_call.1
= control target key start
LH: loop header
LB: loop body
LE: loop exit
PB: predicated region body
PF: predicated region fallthrough
CT: control target
= control target key end

     0   :  { %s4028_s0 = inlined_call_operand.hbm [shape: bf16[4096,1152], index: 0, kind: input, shape index: {}]   ;;  %s4029_s1 = inlined_call_operand.hbm [shape: bf16[1152,128], index: 1, kind: input, shape index: {}]   ;;  %s4030_s2 = inlined_call_operand.hbm [shape: f32[1,128], index: 2, kind: input, shape index: {}]   ;;  %s4031_s3 = inlined_call_operand.hbm [shape: f32[4096,128], index: 3, kind: output, shape index: {}]  }
   0x1   :  { %4051 = sst [smem:[#allocation25_spill]] %s4028_s0 }
   0x2   :  { %4052 = sst [smem:[#allocation26_spill]] %s4030_s2 }
   0x3   :  { %4053 = sst [smem:[#allocation27_spill]] %s4031_s3 }
   0x4   :  { %8 = vsyncpa [#allocation4], 0 }
   0x5   :  { %10 = vsyncpa [#allocation4 + $0x1], 0 }
   0x6   :  { %11 = vsyncpa [#allocation7], 0 }
   0x7   :  { %13 = vsyncpa [#allocation7 + $0x1], 0 }
   0x8   :  { %14 = vsyncpa [#allocation5], 0 }
   0x9   :  { %16 = vsyncpa [#allocation5 + $0x1], 0  ;;  %s3177_s12 = smov 0   ;;  %s3179_s13 = smov 0  }
   0xa   :  { %s3181_s14 = smov 0   ;;  %s3183_s15 = smov 0  }
   0xb   :  { %s3185_s16 = smov 0   ;;  %s3187_s17 = smov 0  }
   0xc   :  { %s3189_s18 = smov 0   ;;  %s3191_s19 = smov 0  }
   0xd   :  { %s3193_s20 = smov 0   ;;  %s3195_s21 = smov 0  }
   0xe   :  { %s3197_s22 = smov 0   ;;  %s3199_s23 = smov 0  }
   0xf   :  { %s3201_s24 = smov 0   ;;  %s3203_s25 = smov 0  }
  0x10 LB: > { %4054 = sst [smem:[#allocation14_spill]] %s3090_s12  ;;  %s3244_s26 = sadd.s32 4294967295, %s3142_s25   ;;  %s3142_s25 = sphi %s3203_s25, %s22_s25   ;;  %s3138_s24 = sphi %s3201_s24, %s4119_s24   ;;  %s3134_s23 = sphi %s3199_s23, %s4118_s23   ;;  %s3130_s22 = sphi %s3197_s22, %s4117_s22   ;;  %s3126_s21 = sphi %s3195_s21, %s4116_s21   ;;  %s3122_s20 = sphi %s3193_s20, %s4115_s20   ;;  %s3118_s19 = sphi %s3191_s19, %s4114_s19   ;;  %s3114_s18 = sphi %s3189_s18, %s4113_s18   ;;  %s3110_s17 = sphi %s3187_s17, %s4112_s17   ;;  %s3106_s16 = sphi %s3185_s16, %s4111_s16   ;;  %s3102_s15 = sphi %s3183_s15, %s4105_s15   ;;  %s3098_s14 = sphi %s3181_s14, %s4110_s14   ;;  %s3094_s13 = sphi %s3179_s13, %s4109_s13   ;;  %s3090_s12 = sphi %s3177_s12, %s4103_s12  }
  0x11   : > { %4055 = sst [smem:[#allocation15_spill]] %s3094_s13  ;;  %s2299_s27 = sadd.s32 4294967294, %s3142_s25  }
  0x12   : > { %4056 = sst [smem:[#allocation16_spill]] %s3106_s16  ;;  %p57_p0 = scmp.ne.s32.totalorder %s3122_s20, %s3118_s19 }
  0x13   : > { %4057 = sst [smem:[#allocation17_spill]] %s3126_s21  ;;  %p58_p1 = scmp.eq.s32.totalorder %s3142_s25, 0 }
  0x14   : > { %4058 = sst [smem:[#allocation18_spill]] %s3130_s22  ;;  %p63_p2 = scmp.ne.s32.totalorder %s3118_s19, %s3114_s18 }
  0x15   : > { %p4032_p3 = scmp.eq.s32.totalorder %s3244_s26, 0  ;;  %p3254_p4 = por %p58_p1, %p57_p0 }
  0x16   : > { %p85_p5 = scmp.ne.s32.totalorder %s3110_s17, %s3106_s16  ;;  %p91_p7 = scmp.ne.s32.totalorder %s3106_s16, %s3102_s15 }
  0x17   : > { %p3262_p6 = por %p4032_p3, %p63_p2  ;;  %p142_p10 = scmp.ne.s32.totalorder %s3098_s14, %s3094_s13 }
  0x18   : > { %p3267_p8 = por %p85_p5, %p58_p1  ;;  %p3274_p9 = por %p91_p7, %p4032_p3 }
  0x19   : > { %s4060_s4 = scalar_select %p3262_p6, 1, 0 }
  0x1a   : > { %s4062_s7 = scalar_select %p3274_p9, 1, 0 }
  0x1b   : > { %p143_p11 = scmp.eq.s32.totalorder %s3244_s26, 23  ;;  %p148_p12 = scmp.ne.s32.totalorder %s3094_s13, %s3090_s12 }
  0x1c   : > { %4063 = sst [smem:[#allocation19_spill]] %s4062_s7  ;;  %p149_p13 = scmp.eq.s32.totalorder %s2299_s27, 23 }
  0x1d   : > { %p2300_p0 = scmp.ge.s32.totalorder %s3142_s25, 1  ;;  %p3284_p2 = por %p143_p11, %p142_p10 }
  0x1e   : > { %p156_p1 = scmp.lt.s32.totalorder %s3142_s25, 25  ;;  %p3289_p5 = por %p149_p13, %p148_p12 }
  0x1f   : > { %s4064_s8 = scalar_select %p3284_p2, 1, 0 }
  0x20   : > { %s4066_s9 = scalar_select %p3289_p5, 1, 0 }
  0x21   : > { %4065 = sst [smem:[#allocation20_spill]] %s4064_s8  ;;  %p3293_p7 = pnand %p2300_p0, %p156_p1 }
  0x22   : > { %4067 = sst [smem:[#allocation21_spill]] %s4066_s9  ;;  %s3144_s11 = smov [#allocation8]  }
  0x23   : > { %s4068_s10 = scalar_select %p3293_p7, 1, 0 }
  0x24   : > { %s171_s15 = sshll.u32 %s3144_s11, 4  ;;  %p2607_p3 = pneg %p3293_p7  ;;  %s172_s15 = int_to_ptr.vmem [resolvable:$true] %s171_s15 }
  0x25   : > { %p2623_p9 = scmp.lt.s32.totalorder %s3142_s25, 24  ;;  %p4069_p10 = scmp.eq.s32.totalorder %s3244_s26, 0 }
  0x26   : > { %s4073_s2 = sld [smem:[#allocation26_spill]] }
  0x27   : > { %p3302_p11 = pnand %p2607_p3, %p4069_p10  ;;  %p3308_p12 = pnand %p2623_p9, %p3254_p4 }
  0x28   : > { %p3314_p13 = pnand %p2623_p9, %p3267_p8 }
  0x29   : > { %s4071_s27 = scalar_select %p3308_p12, 1, 0 }
  0x2a   : > { %s4072_s28 = scalar_select %p3314_p13, 1, 0 }
  0x2b   : > { %p2902_p0 = pneg %p3302_p11 }
  0x2c   : > { %s2900_s29 = scalar_lea.hbm %s4073_s2, 16 }
  0x2d   : > { %p2901_p3 = scmp.ne.s32.totalorder %s4073_s2, %s2900_s29  ;;  %p2907_p10 = scmp.lt.u32.totalorder %s2900_s29, %s4073_s2 }
  0x2f   : > { %p2903_p1 = pnand %p2902_p0, %p2901_p3 }
  0x31   : > { %p2904_p4 = pneg %p2903_p1 }
  0x33   : > { %p2909_p8 = pnand %p2907_p10, %p2904_p4 }
  0x35   : > { %2912 = shalt.err (!%p2909_p8)
}
  0x36   : > { %s2913_s5 = scalar_lea.vmem %s172_s15, 16  ;;  %s2920_s6 = scalar_lea.vmem %s172_s15, 32 }
  0x37   : > { %p2914_p9 = scmp.ne.s32.totalorder %s172_s15, %s2913_s5  ;;  %p2921_p6 = scmp.lt.s32.totalorder %s172_s15, %s172_s15 }
  0x38   : > { %p2922_p7 = scmp.lt.s32.totalorder %s2920_s6, %s2913_s5 }
  0x39   : > { %p2916_p5 = pnand %p2914_p9, %p2902_p0 }
  0x3a   : > { %p2923_p13 = por %p2922_p7, %p2921_p6 }
  0x3b   : > { %p2917_p2 = pneg %p2916_p5 }
  0x3d   : > { %p2924_p12 = pnand %p2923_p13, %p2917_p2 }
  0x3f   : > { %2927 = shalt.err (!%p2924_p12)
}
  0x40   : > { %2610 = dma.hbm_to_vmem [thread:$0]  (!%p3302_p11), %s4073_s2, 16, %s172_s15, [#allocation7]  }
  0x41   : > { %s41_s3 = sadd.s32 1, %s3138_s24  ;;  %s34_s29 = sadd.s32 1, %s3134_s23 }
  0x42   : > { %s182_s11 = sand.u32 1, %s3122_s20   ;;  %p35_p6 = scmp.ge.s32.totalorder %s34_s29, 3 }
  0x43   : > { %s2592_s30 = smul.u32 768, %s182_s11  ;;  %s4076_s12 = sadd.s32 1, %s3110_s17 }
  0x44   : > { %s4121_s29 = smov (%p35_p6, %s34_s29), 0  ;;  %s4123_s3 = smov (!%p35_p6, %s41_s3), %s3138_s24 }
  0x45   : > { %4074 = sst [smem:[#allocation22_spill]] %s4121_s29  ;;  %s46_s18 = ssub.s32 %s3134_s23, %s4121_s29 }
  0x46   : > { %p43_p2 = scmp.ge.s32.totalorder %s4123_s3, 8  ;;  %p76_p5 = scmp.eq.s32.totalorder %s46_s18, 0 }
  0x47   : > { %s188_s5 = smul.u32 3, %s3134_s23  ;;  %s186_s15 = scalar_lea.vmem [#allocation3], %s2592_s30 }
  0x48   : > { %s196_s6 = sshll.u32 %s186_s15, 4  ;;  %s4125_s3 = smov (%p43_p2, %s4123_s3), 0  ;;  %s3363_s6 = int_to_ptr.vmem [resolvable:$true] %s196_s6 }
  0x49   : > { %4075 = sst [smem:[#allocation23_spill]] %s4125_s3  ;;  %s45_s2 = ssub.s32 %s3138_s24, %s4125_s3 }
  0x4a   : > { %s3348_s9 = scalar_select %p76_p5, %s3110_s17, %s4076_s12  }
  0x4b   : > { %s2593_s8 = smul.u32 576, %s3138_s24  ;;  %s47_s22 = sor.u32 %s46_s18, %s45_s2 }
  0x4c   : > { %4077 = sst [smem:[#allocation24_spill]] %s3348_s9  ;;  %p130_p7 = scmp.eq.s32.totalorder %s45_s2, 0 }
  0x4d   : > { %p48_p11 = scmp.eq.s32.totalorder %s47_s22, 0  ;;  %s193_s29 = sadd.s32 %s2593_s8, %s188_s5 }
  0x4e   : > { %s4078_s21 = sadd.s32 1, %s3098_s14  ;;  %s4079_s7 = sadd.s32 1, %s3122_s20 }
  0x4f   : > { %s3356_s13 = scalar_select %p130_p7, %s3098_s14, %s4078_s21  }
  0x50   : > { %s3361_s30 = scalar_select %p48_p11, %s3122_s20, %s4079_s7  }
  0x51   : > { %s2305_s15 = sshll.u32 %s193_s29, 6  ;;  %s4080_s0 = sld [smem:[#allocation25_spill]] }
  0x52   : > { %s3371_s22 = scalar_lea.sflag [#allocation4], %s182_s11  ;;  %p4081_p13 = scmp.ne.s32.totalorder %s4071_s27, 0 }
  0x54   : > { %p2930_p3 = pneg %p4081_p13 }
  0x57   : > { %s3368_s9 = scalar_lea.hbm %s4080_s0, %s2305_s15  ;;  %s2933_s16 = scalar_lea.hbm %s4080_s0, 294912 }
  0x58   : > { %s2928_s21 = scalar_lea.hbm %s3368_s9, 12288  ;;  %p2934_p4 = scmp.lt.u32.totalorder %s3368_s9, %s4080_s0 }
  0x59   : > { %p2929_p12 = scmp.ne.s32.totalorder %s3368_s9, %s2928_s21  ;;  %p2935_p10 = scmp.lt.u32.totalorder %s2933_s16, %s2928_s21 }
  0x5a   : > { %p2937_p9 = scmp.lt.u32.totalorder %s2928_s21, %s3368_s9 }
  0x5b   : > { %p2931_p0 = pnand %p2930_p3, %p2929_p12  ;;  %p2936_p8 = por %p2935_p10, %p2934_p4 }
  0x5d   : > { %p2932_p1 = pneg %p2931_p0  ;;  %p2938_p6 = por %p2937_p9, %p2936_p8 }
  0x5f   : > { %p2939_p2 = pnand %p2938_p6, %p2932_p1 }
  0x61   : > { %2942 = shalt.err (!%p2939_p2)
}
  0x62   : > { %s2943_s11 = scalar_lea.vmem %s3363_s6, 12288  ;;  %s3145_s5 = smov [#allocation3]  }
  0x63   : > { %p2944_p5 = scmp.ne.s32.totalorder %s3363_s6, %s2943_s11  ;;  %s2948_s15 = sshll.u32 %s3145_s5, 4  ;;  %s2949_s15 = int_to_ptr.vmem [resolvable:$false] %s2948_s15 }
  0x64   : > { %s2950_s12 = scalar_lea.vmem %s2949_s15, 24576  ;;  %p2951_p12 = scmp.lt.s32.totalorder %s3363_s6, %s2949_s15 }
  0x65   : > { %p2946_p7 = pnand %p2944_p5, %p2930_p3  ;;  %p2952_p0 = scmp.lt.s32.totalorder %s2950_s12, %s2943_s11 }
  0x67   : > { %p2947_p11 = pneg %p2946_p7  ;;  %p2953_p4 = por %p2952_p0, %p2951_p12 }
  0x69   : > { %p2954_p10 = pnand %p2953_p4, %p2947_p11 }
  0x6b   : > { %2957 = shalt.err (!%p2954_p10)
}
  0x6c   : > { %s3146_s21 = smov 576   ;;  %s3147_s7 = smov 192  }
  0x6d   : > { %s3148_s8 = smov 12   ;;  %s208_s16 = sand.u32 1, %s3110_s17  }
  0x6e   : > { %2614 = dma.hbm_to_vmem [thread:$0]  (!%p4081_p13), %s3368_s9, 12288, %s3363_s6, %s3371_s22, %s3146_s21, %s3147_s7, %s3148_s8  }
  0x6f   : > { %s2594_s29 = smul.u32 192, %s208_s16  ;;  %s4082_s0 = sand.u32 1, %s3142_s25  }
  0x70   : > { %s2438_s18 = smul.u32 3072, %s3134_s23  ;;  %s3410_s3 = scalar_lea.sflag [#allocation7], %s4082_s0 }
  0x71   : > { %s210_s12 = scalar_lea.vmem [#allocation6], %s2594_s29  ;;  %p4083_p3 = scmp.ne.s32.totalorder %s4072_s28, 0 }
  0x72   : > { %s3404_s15 = scalar_lea.hbm %s4029_s1, %s2438_s18  ;;  %s218_s2 = sshll.u32 %s210_s12, 4  ;;  %s3406_s2 = int_to_ptr.vmem [resolvable:$true] %s218_s2 }
  0x73   : > { %s2958_s27 = scalar_lea.hbm %s3404_s15, 3072  ;;  %p2960_p1 = pneg %p4083_p3 }
  0x74   : > { %p2959_p13 = scmp.ne.s32.totalorder %s3404_s15, %s2958_s27  ;;  %s2963_s22 = scalar_lea.hbm %s4029_s1, 9216 }
  0x75   : > { %p2964_p6 = scmp.lt.u32.totalorder %s3404_s15, %s4029_s1  ;;  %p2965_p2 = scmp.lt.u32.totalorder %s2963_s22, %s2958_s27 }
  0x76   : > { %p2961_p8 = pnand %p2960_p1, %p2959_p13  ;;  %p2967_p7 = scmp.lt.u32.totalorder %s2958_s27, %s3404_s15 }
  0x77   : > { %p2966_p5 = por %p2965_p2, %p2964_p6 }
  0x78   : > { %p2962_p9 = pneg %p2961_p8 }
  0x79   : > { %p2968_p11 = por %p2967_p7, %p2966_p5 }
  0x7b   : > { %p2969_p12 = pnand %p2968_p11, %p2962_p9 }
  0x7d   : > { %2972 = shalt.err (!%p2969_p12)
}
  0x7e   : > { %s2973_s0 = scalar_lea.vmem %s3406_s2, 3072  ;;  %s3149_s8 = smov [#allocation6]  }
  0x7f   : > { %p2974_p0 = scmp.ne.s32.totalorder %s3406_s2, %s2973_s0  ;;  %s2978_s16 = sshll.u32 %s3149_s8, 4  ;;  %s2979_s16 = int_to_ptr.vmem [resolvable:$false] %s2978_s16 }
  0x80   : > { %s2980_s29 = scalar_lea.vmem %s2979_s16, 6144  ;;  %p2981_p13 = scmp.lt.s32.totalorder %s3406_s2, %s2979_s16 }
  0x81   : > { %p2976_p4 = pnand %p2974_p0, %p2960_p1  ;;  %p2982_p8 = scmp.lt.s32.totalorder %s2980_s29, %s2973_s0 }
  0x83   : > { %p2977_p10 = pneg %p2976_p4  ;;  %p2983_p6 = por %p2982_p8, %p2981_p13 }
  0x85   : > { %p2984_p2 = pnand %p2983_p6, %p2977_p10 }
  0x87   : > { %2987 = shalt.err (!%p2984_p2)
}
  0x88   : > { %s3150_s18 = smov 64   ;;  %s3151_s11 = smov 4  }
  0x89   : > { %2617 = dma.hbm_to_vmem [thread:$0]  (!%p4083_p3), %s3404_s15, 3072, %s3406_s2, %s3410_s3, %s3150_s18, %s3150_s18, %s3151_s11  }
  0x8a   : > { %p4084_p1 = scmp.ne.s32.totalorder %s4068_s10, 0 }
  0x8b   : > { %s232_s5 = sand.u32 (!%p4084_p1), 1, %s3118_s19   ;;  %p4085_p9 = scmp.ne.s32.totalorder (!%p4084_p1), %s4060_s4, 0 }
  0x8c   : > { %230 = sbr.rel (%p4084_p1) target bundleno = 731 (0x2db), region = 32  ;;  %s233_s27 = scalar_lea.sflag (!%p4084_p1), [#allocation4], %s232_s5 }
  0x8d   : > { %s2595_s12 = smul.u32 (!%p4084_p1), 768, %s232_s5 }
  0x8f   : > { %s3441_s6 = scalar_lea.vmem (!%p4084_p1), [#allocation3], %s2595_s12 }
  0x93   : > { %3073 = dma.done.wait (%p4085_p9), %s233_s27, 12288  }
  0x94   : > { %3075 = vsyncadd (%p4085_p9), %s233_s27, 4294955008  ;;  %s4086_s9 = sld [smem:[#allocation16_spill]]  ;;  %s4087_s22 = sld [smem:[#allocation19_spill]] }
  0x95   : > { %s241_s28 = sand.u32 1, %s3244_s26  }
  0x96   : > { %s242_s10 = scalar_lea.sflag [#allocation7], %s241_s28 }
  0x9a   : > { %s243_s3 = sand.u32 1, %s4086_s9   ;;  %p4088_p3 = scmp.ne.s32.totalorder %s4087_s22, 0 }
  0x9b   : > { %s2596_s2 = smul.u32 192, %s243_s3 }
  0x9d   : > { %s3449_s15 = scalar_lea.vmem [#allocation6], %s2596_s2 }
  0x9e   : > { %3077 = dma.done.wait (%p4088_p3), %s242_s10, 3072  }
  0x9f   : > { %3079 = vsyncadd (%p4088_p3), %s242_s10, 4294964224  ;;  %p4089_p5 = scmp.eq.s32.totalorder %s3244_s26, 0 }
  0xa1   : > { %3081 = dma.done.wait (%p4089_p5), [#allocation7], 16   ;;  %p4090_p7 = pmov %p4089_p5 }
  0xa2   : > { %s4091_s4 = sld [smem:[#allocation15_spill]]  ;;  %s4092_s8 = sld [smem:[#allocation17_spill]] }
  0xa3   : > { %3083 = vsyncadd (%p4090_p7), [#allocation7], 4294967280 }
  0xa8   : > { %s274_s21 = sand.u32 1, %s4091_s4   ;;  %p2310_p11 = scmp.ne.s32.totalorder %s4092_s8, 0 }
  0xa9   : > { %s2309_s7 = sshll.u32 %s274_s21, 9  ;;  %v3152_v0 = vmov (!%p2310_p11), 0.0  }
  0xaa   : > { %s3462_s0 = scalar_lea.vmem [#allocation9], %s2309_s7  ;;  %285 = sbr.rel (%p2310_p11) target bundleno = 202 (0xca), region = 48  ;;  %286 = vst [vmem:[#allocation2] sm:$0xff] (!%p2310_p11), %v3152_v0  ;;  %287 = vst [vmem:[#allocation2 + $0x8] sm:$0xff] (!%p2310_p11), %v3152_v0 }
  0xab   : > { %288 = vst [vmem:[#allocation2 + $0x10] sm:$0xff] (!%p2310_p11), %v3152_v0  ;;  %289 = vst [vmem:[#allocation2 + $0x18] sm:$0xff] (!%p2310_p11), %v3152_v0 }
  0xac   : > { %290 = vst [vmem:[#allocation2 + $0x20] sm:$0xff] (!%p2310_p11), %v3152_v0  ;;  %291 = vst [vmem:[#allocation2 + $0x28] sm:$0xff] (!%p2310_p11), %v3152_v0 }
  0xad   : > { %292 = vst [vmem:[#allocation2 + $0x30] sm:$0xff] (!%p2310_p11), %v3152_v0  ;;  %293 = vst [vmem:[#allocation2 + $0x38] sm:$0xff] (!%p2310_p11), %v3152_v0 }
  0xae   : > { %294 = vst [vmem:[#allocation2 + $0x40] sm:$0xff] (!%p2310_p11), %v3152_v0  ;;  %295 = vst [vmem:[#allocation2 + $0x48] sm:$0xff] (!%p2310_p11), %v3152_v0 }
  0xaf   : > { %296 = vst [vmem:[#allocation2 + $0x50] sm:$0xff] (!%p2310_p11), %v3152_v0  ;;  %297 = vst [vmem:[#allocation2 + $0x58] sm:$0xff] (!%p2310_p11), %v3152_v0 }
  0xb0   : > { %298 = vst [vmem:[#allocation2 + $0x60] sm:$0xff] (!%p2310_p11), %v3152_v0  ;;  %299 = vst [vmem:[#allocation2 + $0x68] sm:$0xff] (!%p2310_p11), %v3152_v0 }
  0xb1   : > { %300 = vst [vmem:[#allocation2 + $0x70] sm:$0xff] %v3152_v0  ;;  %301 = vst [vmem:[#allocation2 + $0x78] sm:$0xff] %v3152_v0 }
  0xb2   : > { %302 = vst [vmem:[#allocation2 + $0x80] sm:$0xff] %v3152_v0  ;;  %303 = vst [vmem:[#allocation2 + $0x88] sm:$0xff] %v3152_v0 }
  0xb3   : > { %304 = vst [vmem:[#allocation2 + $0x90] sm:$0xff] %v3152_v0  ;;  %305 = vst [vmem:[#allocation2 + $0x98] sm:$0xff] %v3152_v0 }
  0xb4   : > { %306 = vst [vmem:[#allocation2 + $0xa0] sm:$0xff] %v3152_v0  ;;  %307 = vst [vmem:[#allocation2 + $0xa8] sm:$0xff] %v3152_v0 }
  0xb5   : > { %308 = vst [vmem:[#allocation2 + $0xb0] sm:$0xff] %v3152_v0  ;;  %309 = vst [vmem:[#allocation2 + $0xb8] sm:$0xff] %v3152_v0 }
  0xb6   : > { %310 = vst [vmem:[#allocation2 + $0xc0] sm:$0xff] %v3152_v0  ;;  %311 = vst [vmem:[#allocation2 + $0xc8] sm:$0xff] %v3152_v0 }
  0xb7   : > { %312 = vst [vmem:[#allocation2 + $0xd0] sm:$0xff] %v3152_v0  ;;  %313 = vst [vmem:[#allocation2 + $0xd8] sm:$0xff] %v3152_v0 }
  0xb8   : > { %314 = vst [vmem:[#allocation2 + $0xe0] sm:$0xff] %v3152_v0  ;;  %315 = vst [vmem:[#allocation2 + $0xe8] sm:$0xff] %v3152_v0 }
  0xb9   : > { %316 = vst [vmem:[#allocation2 + $0xf0] sm:$0xff] %v3152_v0  ;;  %317 = vst [vmem:[#allocation2 + $0xf8] sm:$0xff] %v3152_v0 }
  0xba   : > { %318 = vst [vmem:[#allocation2 + $0x100] sm:$0xff] %v3152_v0  ;;  %319 = vst [vmem:[#allocation2 + $0x108] sm:$0xff] %v3152_v0 }
  0xbb   : > { %320 = vst [vmem:[#allocation2 + $0x110] sm:$0xff] %v3152_v0  ;;  %321 = vst [vmem:[#allocation2 + $0x118] sm:$0xff] %v3152_v0 }
  0xbc   : > { %322 = vst [vmem:[#allocation2 + $0x120] sm:$0xff] %v3152_v0  ;;  %323 = vst [vmem:[#allocation2 + $0x128] sm:$0xff] %v3152_v0 }
  0xbd   : > { %324 = vst [vmem:[#allocation2 + $0x130] sm:$0xff] %v3152_v0  ;;  %325 = vst [vmem:[#allocation2 + $0x138] sm:$0xff] %v3152_v0 }
  0xbe   : > { %326 = vst [vmem:[#allocation2 + $0x140] sm:$0xff] %v3152_v0  ;;  %327 = vst [vmem:[#allocation2 + $0x148] sm:$0xff] %v3152_v0 }
  0xbf   : > { %328 = vst [vmem:[#allocation2 + $0x150] sm:$0xff] %v3152_v0  ;;  %329 = vst [vmem:[#allocation2 + $0x158] sm:$0xff] %v3152_v0 }
  0xc0   : > { %330 = vst [vmem:[#allocation2 + $0x160] sm:$0xff] %v3152_v0  ;;  %331 = vst [vmem:[#allocation2 + $0x168] sm:$0xff] %v3152_v0 }
  0xc1   : > { %332 = vst [vmem:[#allocation2 + $0x170] sm:$0xff] %v3152_v0  ;;  %333 = vst [vmem:[#allocation2 + $0x178] sm:$0xff] %v3152_v0 }
  0xc2   : > { %334 = vst [vmem:[#allocation2 + $0x180] sm:$0xff] %v3152_v0  ;;  %335 = vst [vmem:[#allocation2 + $0x188] sm:$0xff] %v3152_v0 }
  0xc3   : > { %336 = vst [vmem:[#allocation2 + $0x190] sm:$0xff] %v3152_v0  ;;  %337 = vst [vmem:[#allocation2 + $0x198] sm:$0xff] %v3152_v0 }
  0xc4   : > { %338 = vst [vmem:[#allocation2 + $0x1a0] sm:$0xff] %v3152_v0  ;;  %339 = vst [vmem:[#allocation2 + $0x1a8] sm:$0xff] %v3152_v0 }
  0xc5   : > { %340 = vst [vmem:[#allocation2 + $0x1b0] sm:$0xff] %v3152_v0  ;;  %341 = vst [vmem:[#allocation2 + $0x1b8] sm:$0xff] %v3152_v0 }
  0xc6   : > { %342 = vst [vmem:[#allocation2 + $0x1c0] sm:$0xff] %v3152_v0  ;;  %343 = vst [vmem:[#allocation2 + $0x1c8] sm:$0xff] %v3152_v0 }
  0xc7   : > { %344 = vst [vmem:[#allocation2 + $0x1d0] sm:$0xff] %v3152_v0  ;;  %345 = vst [vmem:[#allocation2 + $0x1d8] sm:$0xff] %v3152_v0 }
  0xc8   : > { %346 = vst [vmem:[#allocation2 + $0x1e0] sm:$0xff] %v3152_v0  ;;  %347 = vst [vmem:[#allocation2 + $0x1e8] sm:$0xff] %v3152_v0 }
  0xc9   : > { %348 = vst [vmem:[#allocation2 + $0x1f0] sm:$0xff] %v3152_v0  ;;  %349 = vst [vmem:[#allocation2 + $0x1f8] sm:$0xff] %v3152_v0 }
  0xca PF: > { %v2748_v1 = vld [vmem:[%s3449_s15] sm:$0xff]   ;;  %v3153_v2 = vmov 0   ;;  %v2749_v3 = vld [vmem:[%s3449_s15 + $0x8] sm:$0xff]   ;;  %v2750_v4 = vld [vmem:[%s3449_s15 + $0x10] sm:$0xff]   ;;  %s4093_s26 = sld [smem:[#allocation17_spill]] }
  0xcb   : > { %1246 = vmatprep.subr.bf16.mxu0 %v3153_v2  ;;  %2560 = vmatprep.subr.bf16.mxu1 %v3153_v2  ;;  %v2751_v5 = vld [vmem:[%s3449_s15 + $0x18] sm:$0xff]   ;;  %v2752_v6 = vld [vmem:[%s3449_s15 + $0x20] sm:$0xff]   ;;  %v2753_v8 = vld [vmem:[%s3449_s15 + $0x28] sm:$0xff]  }
  0xcc   : > { %1247 = vmatpush1.bf16.msra.mxu0 %v2748_v1  ;;  %2576 = vmatpush1.bf16.msra.mxu1 %v2748_v1  ;;  %v2766_v7 = vld [vmem:[%s3441_s6 + $0x4] ss:$12 sps:$4 sm:$0xff]   ;;  %v2755_v11 = vld [vmem:[%s3449_s15 + $0x38] sm:$0xff]   ;;  %v2757_v13 = vld [vmem:[%s3449_s15 + $0x48] sm:$0xff]  }
  0xcd   : > { %1248 = vmatprep.subr.bf16.mxu0 %v3153_v2  ;;  %2561 = vmatprep.subr.bf16.mxu1 %v3153_v2  ;;  %v2769_v9 = vld [vmem:[%s3441_s6 + $0x244] ss:$12 sps:$4 sm:$0xff]   ;;  %v2759_v15 = vld [vmem:[%s3449_s15 + $0x58] sm:$0xff]   ;;  %v2761_v17 = vld [vmem:[%s3449_s15 + $0x68] sm:$0xff]  }
  0xce   : > { %1278 = vmatprep.mubr.bf16.mxu0 %v2766_v7  ;;  %1470 = vmatprep.mubr.bf16.mxu1 %v2769_v9  ;;  %v2754_v10 = vld [vmem:[%s3449_s15 + $0x30] sm:$0xff]   ;;  %v2756_v12 = vld [vmem:[%s3449_s15 + $0x40] sm:$0xff]   ;;  %v2763_v19 = vld [vmem:[%s3449_s15 + $0x78] sm:$0xff]  }
  0xcf   : > { %v2758_v14 = vld [vmem:[%s3449_s15 + $0x50] sm:$0xff]   ;;  %v2760_v16 = vld [vmem:[%s3449_s15 + $0x60] sm:$0xff]   ;;  %v2771_v23 = vld [vmem:[%s3441_s6 + $0x1c] ss:$12 sps:$4 sm:$0xff]  }
  0xd0   : > { %1249 = vmatpush1.bf16.msra.mxu0 %v2749_v3  ;;  %2577 = vmatpush1.bf16.msra.mxu1 %v2749_v3  ;;  %v2762_v18 = vld [vmem:[%s3449_s15 + $0x70] sm:$0xff]   ;;  %v2770_v20 = vld [vmem:[%s3449_s15 + $0x80] sm:$0xff]   ;;  %v2773_v24 = vld [vmem:[%s3441_s6 + $0x25c] ss:$12 sps:$4 sm:$0xff]   ;;  %p2431_p12 = scmp.ne.s32.totalorder %s4093_s26, 2 }
  0xd1   : > { %1250 = vmatprep.subr.bf16.mxu0 %v3153_v2  ;;  %2562 = vmatprep.subr.bf16.mxu1 %v3153_v2  ;;  %v2764_v21 = vld [vmem:[%s3441_s6] ss:$12 sps:$4 sm:$0xff]   ;;  %v2784_v26 = vld [vmem:[%s3449_s15 + $0x90] sm:$0xff]   ;;  %v2775_v27 = vld [vmem:[%s3441_s6 + $0x18] ss:$12 sps:$4 sm:$0xff]  }
  0xd2   : > { %v2767_v22 = vld [vmem:[%s3441_s6 + $0x240] ss:$12 sps:$4 sm:$0xff]   ;;  %v2776_v28 = vld [vmem:[%s3441_s6 + $0x258] ss:$12 sps:$4 sm:$0xff]   ;;  %v2782_v32 = vld [vmem:[%s3441_s6 + $0x30] ss:$12 sps:$4 sm:$0xff]  }
  0xd3   : > { %v2777_v25 = vld [vmem:[%s3449_s15 + $0x88] sm:$0xff]   ;;  %v2778_v29 = vld [vmem:[%s3441_s6 + $0x34] ss:$12 sps:$4 sm:$0xff]   ;;  %v2791_v31 = vld [vmem:[%s3449_s15 + $0x98] sm:$0xff]  }
  0xd4   : > { %1251 = vmatpush1.bf16.msra.mxu0 %v2750_v4  ;;  %2578 = vmatpush1.bf16.msra.mxu1 %v2750_v4  ;;  %v2780_v30 = vld [vmem:[%s3441_s6 + $0x274] ss:$12 sps:$4 sm:$0xff]   ;;  %v2783_v34 = vld [vmem:[%s3441_s6 + $0x270] ss:$12 sps:$4 sm:$0xff]   ;;  %v2785_v35 = vld [vmem:[%s3441_s6 + $0x4c] ss:$12 sps:$4 sm:$0xff]  }
  0xd5   : > { %1252 = vmatprep.subr.bf16.mxu0 %v3153_v2  ;;  %2563 = vmatprep.subr.bf16.mxu1 %v3153_v2  ;;  %v2798_v33 = vld [vmem:[%s3449_s15 + $0xa0] sm:$0xff]   ;;  %v2787_v36 = vld [vmem:[%s3441_s6 + $0x28c] ss:$12 sps:$4 sm:$0xff]   ;;  %v2789_v38 = vld [vmem:[%s3441_s6 + $0x48] ss:$12 sps:$4 sm:$0xff]  }
  0xd6   : > { %v2805_v37 = vld [vmem:[%s3449_s15 + $0xa8] sm:$0xff]   ;;  %v2792_v40 = vld [vmem:[%s3441_s6 + $0x64] ss:$12 sps:$4 sm:$0xff]   ;;  %v2819_v43 = vld [vmem:[%s3449_s15 + $0xb8] sm:$0xff]  }
  0xd7   : > { %v2790_v39 = vld [vmem:[%s3441_s6 + $0x288] ss:$12 sps:$4 sm:$0xff]   ;;  %v2794_v41 = vld [vmem:[%s3441_s6 + $0x2a4] ss:$12 sps:$4 sm:$0xff]   ;;  %v2796_v44 = vld [vmem:[%s3441_s6 + $0x60] ss:$12 sps:$4 sm:$0xff]  }
  0xd8   : > { %1253 = vmatpush1.bf16.msra.mxu0 %v2751_v5  ;;  %2579 = vmatpush1.bf16.msra.mxu1 %v2751_v5  ;;  %v2812_v42 = vld [vmem:[%s3449_s15 + $0xb0] sm:$0xff]   ;;  %v2797_v45 = vld [vmem:[%s3441_s6 + $0x2a0] ss:$12 sps:$4 sm:$0xff]   ;;  %v2799_v46 = vld [vmem:[%s3441_s6 + $0x7c] ss:$12 sps:$4 sm:$0xff]  }
  0xd9   : > { %1254 = vmatprep.subr.bf16.mxu0 %v3153_v2  ;;  %2564 = vmatprep.subr.bf16.mxu1 %v3153_v2  ;;  %v2801_v47 = vld [vmem:[%s3441_s6 + $0x2bc] ss:$12 sps:$4 sm:$0xff]   ;;  %v2803_v48 = vld [vmem:[%s3441_s6 + $0x78] ss:$12 sps:$4 sm:$0xff]   ;;  %v2806_v50 = vld [vmem:[%s3441_s6 + $0x94] ss:$12 sps:$4 sm:$0xff]  }
  0xda   : > { %v2804_v49 = vld [vmem:[%s3441_s6 + $0x2b8] ss:$12 sps:$4 sm:$0xff]   ;;  %v2808_v51 = vld [vmem:[%s3441_s6 + $0x2d4] ss:$12 sps:$4 sm:$0xff]   ;;  %v2810_v52 = vld [vmem:[%s3441_s6 + $0x90] ss:$12 sps:$4 sm:$0xff]  }
  0xdb   : > { %v2811_v53 = vld [vmem:[%s3441_s6 + $0x2d0] ss:$12 sps:$4 sm:$0xff]   ;;  %v2813_v54 = vld [vmem:[%s3441_s6 + $0xac] ss:$12 sps:$4 sm:$0xff]   ;;  %v2817_v56 = vld [vmem:[%s3441_s6 + $0xa8] ss:$12 sps:$4 sm:$0xff]  }
  0xdc   : > { %1255 = vmatpush1.bf16.msra.mxu0 %v2752_v6  ;;  %2580 = vmatpush1.bf16.msra.mxu1 %v2752_v6  ;;  %v2815_v55 = vld [vmem:[%s3441_s6 + $0x2ec] ss:$12 sps:$4 sm:$0xff]   ;;  %v2818_v57 = vld [vmem:[%s3441_s6 + $0x2e8] ss:$12 sps:$4 sm:$0xff]   ;;  %v2820_v58 = vld [vmem:[%s3441_s6 + $0xc4] ss:$12 sps:$4 sm:$0xff]  }
  0xdd   : > { %1256 = vmatprep.subr.bf16.mxu0 %v3153_v2  ;;  %2565 = vmatprep.subr.bf16.mxu1 %v3153_v2  ;;  %v2822_v59 = vld [vmem:[%s3441_s6 + $0x8] ss:$12 sps:$4 sm:$0xff]   ;;  %v2823_v60 = vld [vmem:[%s3441_s6 + $0xc0] ss:$12 sps:$4 sm:$0xff]   ;;  %v2827_v63 = vld [vmem:[%s3441_s6 + $0x38] ss:$12 sps:$4 sm:$0xff]  }
  0xde   : > { %v2824_v61 = vld [vmem:[%s3441_s6 + $0x20] ss:$12 sps:$4 sm:$0xff]   ;;  %v2825_v62 = vld [vmem:[%s3441_s6 + $0xdc] ss:$12 sps:$4 sm:$0xff]   ;;  %v2828_v0 = vld [vmem:[%s3441_s6 + $0xd8] ss:$12 sps:$4 sm:$0xff]  }
  0xdf   : > { %v2829_v1 = vld [vmem:[%s3441_s6 + $0x50] ss:$12 sps:$4 sm:$0xff]   ;;  %v2832_v3 = vld [vmem:[%s3441_s6 + $0x68] ss:$12 sps:$4 sm:$0xff]   ;;  %v2834_v5 = vld [vmem:[%s3441_s6 + $0x80] ss:$12 sps:$4 sm:$0xff]  }
  0xe0   : > { %1257 = vmatpush1.bf16.msra.mxu0 %v2753_v8  ;;  %2581 = vmatpush1.bf16.msra.mxu1 %v2753_v8  ;;  %v2833_v4 = vld [vmem:[%s3441_s6 + $0xf0] ss:$12 sps:$4 sm:$0xff]   ;;  %v2835_v6 = vld [vmem:[%s3441_s6 + $0x10c] ss:$12 sps:$4 sm:$0xff]   ;;  %v2838_v8 = vld [vmem:[%s3441_s6 + $0x108] ss:$12 sps:$4 sm:$0xff]  }
  0xe1   : > { %1258 = vmatprep.subr.bf16.mxu0 %v3153_v2  ;;  %2566 = vmatprep.subr.bf16.mxu1 %v3153_v2  ;;  %v2837_v7 = vld [vmem:[%s3441_s6 + $0x98] ss:$12 sps:$4 sm:$0xff]   ;;  %v2839_v9 = vld [vmem:[%s3441_s6 + $0xb0] ss:$12 sps:$4 sm:$0xff]  }
  0xe4   : > { %1259 = vmatpush1.bf16.msra.mxu0 %v2754_v10  ;;  %2582 = vmatpush1.bf16.msra.mxu1 %v2754_v10  ;;  %v2840_v10 = vld [vmem:[%s3441_s6 + $0x124] ss:$12 sps:$4 sm:$0xff]  }
  0xe5   : > { %1260 = vmatprep.subr.bf16.mxu0 %v3153_v2  ;;  %2567 = vmatprep.subr.bf16.mxu1 %v3153_v2 }
  0xe8   : > { %1261 = vmatpush1.bf16.msra.mxu0 %v2755_v11  ;;  %2583 = vmatpush1.bf16.msra.mxu1 %v2755_v11  ;;  %v2842_v11 = vld [vmem:[%s3441_s6 + $0xc8] ss:$12 sps:$4 sm:$0xff]  }
  0xe9   : > { %1262 = vmatprep.subr.bf16.mxu0 %v3153_v2  ;;  %2568 = vmatprep.subr.bf16.mxu1 %v3153_v2 }
  0xec   : > { %1263 = vmatpush1.bf16.msra.mxu0 %v2756_v12  ;;  %2584 = vmatpush1.bf16.msra.mxu1 %v2756_v12  ;;  %v2843_v12 = vld [vmem:[%s3441_s6 + $0x120] ss:$12 sps:$4 sm:$0xff]  }
  0xed   : > { %1264 = vmatprep.subr.bf16.mxu0 %v3153_v2  ;;  %2569 = vmatprep.subr.bf16.mxu1 %v3153_v2 }
  0xf0   : > { %1265 = vmatpush1.bf16.msra.mxu0 %v2757_v13  ;;  %2585 = vmatpush1.bf16.msra.mxu1 %v2757_v13  ;;  %v2844_v13 = vld [vmem:[%s3441_s6 + $0xe0] ss:$12 sps:$4 sm:$0xff]  }
  0xf1   : > { %1266 = vmatprep.subr.bf16.mxu0 %v3153_v2  ;;  %2570 = vmatprep.subr.bf16.mxu1 %v3153_v2 }
  0xf4   : > { %1267 = vmatpush1.bf16.msra.mxu0 %v2758_v14  ;;  %2586 = vmatpush1.bf16.msra.mxu1 %v2758_v14  ;;  %v2845_v14 = vld [vmem:[%s3441_s6 + $0x13c] ss:$12 sps:$4 sm:$0xff]  }
  0xf5   : > { %1268 = vmatprep.subr.bf16.mxu0 %v3153_v2  ;;  %2571 = vmatprep.subr.bf16.mxu1 %v3153_v2 }
  0xf8   : > { %1269 = vmatpush1.bf16.msra.mxu0 %v2759_v15  ;;  %2587 = vmatpush1.bf16.msra.mxu1 %v2759_v15  ;;  %v2847_v15 = vld [vmem:[%s3441_s6 + $0xf8] ss:$12 sps:$4 sm:$0xff]  }
  0xf9   : > { %1270 = vmatprep.subr.bf16.mxu0 %v3153_v2  ;;  %2572 = vmatprep.subr.bf16.mxu1 %v3153_v2 }
  0xfc   : > { %1271 = vmatpush1.bf16.msra.mxu0 %v2760_v16  ;;  %2588 = vmatpush1.bf16.msra.mxu1 %v2760_v16  ;;  %v2848_v16 = vld [vmem:[%s3441_s6 + $0x138] ss:$12 sps:$4 sm:$0xff]  }
  0xfd   : > { %1272 = vmatprep.subr.bf16.mxu0 %v3153_v2  ;;  %2573 = vmatprep.subr.bf16.mxu1 %v3153_v2 }
 0x100   : > { %1273 = vmatpush1.bf16.msra.mxu0 %v2761_v17  ;;  %2589 = vmatpush1.bf16.msra.mxu1 %v2761_v17  ;;  %v2849_v17 = vld [vmem:[%s3441_s6 + $0x110] ss:$12 sps:$4 sm:$0xff]  }
 0x101   : > { %1274 = vmatprep.subr.bf16.mxu0 %v3153_v2  ;;  %2574 = vmatprep.subr.bf16.mxu1 %v3153_v2 }
 0x104   : > { %1275 = vmatpush1.bf16.msra.mxu0 %v2762_v18  ;;  %2590 = vmatpush1.bf16.msra.mxu1 %v2762_v18  ;;  %v2850_v18 = vld [vmem:[%s3441_s6 + $0x154] ss:$12 sps:$4 sm:$0xff]  }
 0x105   : > { %1276 = vmatprep.subr.bf16.mxu0 %v3153_v2  ;;  %2575 = vmatprep.subr.bf16.mxu1 %v3153_v2  ;;  %v2830_v2 = vld [vmem:[%s3441_s6 + $0xf4] ss:$12 sps:$4 sm:$0xff]  }
 0x108   : > { %1277 = vmatpush1.bf16.msra.mxu0 %v2763_v19  ;;  %2591 = vmatpush1.bf16.msra.mxu1 %v2763_v19  ;;  %v2852_v19 = vld [vmem:[%s3441_s6 + $0x128] ss:$12 sps:$4 sm:$0xff]  }
 0x109   : > { %2480 = vmatprep.subr.bf16.mxu1 %v2770_v20 }
 0x10b   : > { %1279 = vmatmul.mubr.bf16.vlgmr.msra.gmra.mrb[0].mxu0 %v2764_v21  ;;  %1471 = vmatmul.mubr.bf16.vlgmr.msra.gmra.mrb[0].mxu1 %v2767_v22  ;;  %v2854_v21 = vld [vmem:[%s3441_s6 + $0x140] ss:$12 sps:$4 sm:$0xff]  }
 0x10c   : > { %2481 = vmatpush3.bf16.msra.mxu1 %v2770_v20  ;;  %1286 = vmatprep.mubr.bf16.mxu0 %v2771_v23  ;;  %v2853_v20 = vld [vmem:[%s3441_s6 + $0x150] ss:$12 sps:$4 sm:$0xff]   ;;  %v2855_v22 = vld [vmem:[%s3441_s6 + $0x16c] ss:$12 sps:$4 sm:$0xff]  }
 0x10d   : > { %1478 = vmatprep.mubr.bf16.mxu1 %v2773_v24  ;;  %2482 = vmatprep.subr.bf16.mxu1 %v2777_v25  ;;  %v2857_v23 = vld [vmem:[%s3441_s6 + $0x158] ss:$12 sps:$4 sm:$0xff]   ;;  %v2858_v24 = vld [vmem:[%s3441_s6 + $0x168] ss:$12 sps:$4 sm:$0xff]  }
 0x110   : > { %2483 = vmatpush3.bf16.msra.mxu1 %v2777_v25  ;;  %v2859_v25 = vld [vmem:[%s3441_s6 + $0x170] ss:$12 sps:$4 sm:$0xff]  }
 0x111   : > { %2484 = vmatprep.subr.bf16.mxu1 %v2784_v26 }
 0x113   : > { %1287 = vmatmul.mubr.bf16.gmra.mrb[4].mxu0 %v2775_v27  ;;  %1479 = vmatmul.mubr.bf16.gmra.mrb[4].mxu1 %v2776_v28  ;;  %v2862_v27 = vld [vmem:[%s3441_s6 + $0x188] ss:$12 sps:$4 sm:$0xff]   ;;  %v2863_v28 = vld [vmem:[%s3441_s6 + $0x180] ss:$12 sps:$4 sm:$0xff]  }
 0x114   : > { %1294 = vmatprep.mubr.bf16.mxu0 %v2778_v29  ;;  %1486 = vmatprep.mubr.bf16.mxu1 %v2780_v30  ;;  %v2864_v29 = vld [vmem:[%s3441_s6 + $0x1a0] ss:$12 sps:$4 sm:$0xff]   ;;  %v2865_v30 = vld [vmem:[%s3441_s6 + $0x19c] ss:$12 sps:$4 sm:$0xff]  }
 0x115   : > { %2485 = vmatpush3.bf16.msra.mxu1 %v2784_v26  ;;  %v2860_v26 = vld [vmem:[%s3441_s6 + $0x184] ss:$12 sps:$4 sm:$0xff]  }
 0x116   : > { %2486 = vmatprep.subr.bf16.mxu1 %v2791_v31 }
 0x119   : > { %2487 = vmatpush3.bf16.msra.mxu1 %v2791_v31  ;;  %v2867_v31 = vld [vmem:[%s3441_s6 + $0x1b8] ss:$12 sps:$4 sm:$0xff]  }
 0x11a   : > { %2488 = vmatprep.subr.bf16.mxu1 %v2798_v33 }
 0x11b   : > { %1295 = vmatmul.mubr.bf16.gmra.mrb[8].mxu0 %v2782_v32  ;;  %1487 = vmatmul.mubr.bf16.gmra.mrb[8].mxu1 %v2783_v34  ;;  %v2868_v32 = vld [vmem:[%s3441_s6 + $0x198] ss:$12 sps:$4 sm:$0xff]   ;;  %v2870_v34 = vld [vmem:[%s3441_s6 + $0x1b4] ss:$12 sps:$4 sm:$0xff]  }
 0x11c   : > { %1302 = vmatprep.mubr.bf16.mxu0 %v2785_v35  ;;  %1494 = vmatprep.mubr.bf16.mxu1 %v2787_v36  ;;  %v2872_v35 = vld [vmem:[%s3441_s6 + $0x1e8] ss:$12 sps:$4 sm:$0xff]   ;;  %v2873_v36 = vld [vmem:[%s3441_s6 + $0x1b0] ss:$12 sps:$4 sm:$0xff]  }
 0x11d   : > { %2489 = vmatpush3.bf16.msra.mxu1 %v2798_v33  ;;  %v2869_v33 = vld [vmem:[%s3441_s6 + $0x1d0] ss:$12 sps:$4 sm:$0xff]  }
 0x11e   : > { %2490 = vmatprep.subr.bf16.mxu1 %v2805_v37 }
 0x121   : > { %2491 = vmatpush3.bf16.msra.mxu1 %v2805_v37  ;;  %v2874_v37 = vld [vmem:[%s3441_s6 + $0x200] ss:$12 sps:$4 sm:$0xff]  }
 0x122   : > { %2492 = vmatprep.subr.bf16.mxu1 %v2812_v42 }
 0x123   : > { %1303 = vmatmul.mubr.bf16.gmra.mrb[12].mxu0 %v2789_v38  ;;  %1495 = vmatmul.mubr.bf16.gmra.mrb[12].mxu1 %v2790_v39  ;;  %v2875_v38 = vld [vmem:[%s3441_s6 + $0x1cc] ss:$12 sps:$4 sm:$0xff]  }
 0x124   : > { %1310 = vmatprep.mubr.bf16.mxu0 %v2792_v40  ;;  %1502 = vmatprep.mubr.bf16.mxu1 %v2794_v41  ;;  %v2877_v39 = vld [vmem:[%s3441_s6 + $0x218] ss:$12 sps:$4 sm:$0xff]   ;;  %v2878_v40 = vld [vmem:[%s3441_s6 + $0x1c8] ss:$12 sps:$4 sm:$0xff]   ;;  %v2879_v41 = vld [vmem:[%s3441_s6 + $0x230] ss:$12 sps:$4 sm:$0xff]  }
 0x125   : > { %2493 = vmatpush3.bf16.msra.mxu1 %v2812_v42  ;;  %v2880_v42 = vld [vmem:[%s3441_s6 + $0x1e4] ss:$12 sps:$4 sm:$0xff]  }
 0x126   : > { %2494 = vmatprep.subr.bf16.mxu1 %v2819_v43 }
 0x129   : > { %2495 = vmatpush3.bf16.msra.mxu1 %v2819_v43  ;;  %v2882_v43 = vld [vmem:[%s3441_s6 + $0x248] ss:$12 sps:$4 sm:$0xff]  }
 0x12b   : > { %1311 = vmatmul.mubr.bf16.gmra.mrb[16].mxu0 %v2796_v44  ;;  %1503 = vmatmul.mubr.bf16.gmra.mrb[16].mxu1 %v2797_v45  ;;  %v2883_v44 = vld [vmem:[%s3441_s6 + $0x1e0] ss:$12 sps:$4 sm:$0xff]  }
 0x12c   : > { %1318 = vmatprep.mubr.bf16.mxu0 %v2799_v46  ;;  %1510 = vmatprep.mubr.bf16.mxu1 %v2801_v47  ;;  %v2884_v45 = vld [vmem:[%s3441_s6 + $0x260] ss:$12 sps:$4 sm:$0xff]   ;;  %v2885_v46 = vld [vmem:[%s3441_s6 + $0x1fc] ss:$12 sps:$4 sm:$0xff]   ;;  %v2887_v47 = vld [vmem:[%s3441_s6 + $0x278] ss:$12 sps:$4 sm:$0xff]  }
 0x133   : > { %1319 = vmatmul.mubr.bf16.gmra.mrb[20].mxu0 %v2803_v48  ;;  %1511 = vmatmul.mubr.bf16.gmra.mrb[20].mxu1 %v2804_v49  ;;  %v2888_v48 = vld [vmem:[%s3441_s6 + $0x1f8] ss:$12 sps:$4 sm:$0xff]   ;;  %v2889_v49 = vld [vmem:[%s3441_s6 + $0x290] ss:$12 sps:$4 sm:$0xff]  }
 0x134   : > { %1326 = vmatprep.mubr.bf16.mxu0 %v2806_v50  ;;  %1518 = vmatprep.mubr.bf16.mxu1 %v2808_v51  ;;  %v2890_v50 = vld [vmem:[%s3441_s6 + $0x214] ss:$12 sps:$4 sm:$0xff]  }
 0x135   : > { %v2892_v51 = vld [vmem:[%s3441_s6 + $0x2a8] ss:$12 sps:$4 sm:$0xff]  }
 0x13b   : > { %1327 = vmatmul.mubr.bf16.gmra.mrb[24].mxu0 %v2810_v52  ;;  %1519 = vmatmul.mubr.bf16.gmra.mrb[24].mxu1 %v2811_v53  ;;  %v2893_v52 = vld [vmem:[%s3441_s6 + $0x210] ss:$12 sps:$4 sm:$0xff]   ;;  %v2894_v53 = vld [vmem:[%s3441_s6 + $0x2c0] ss:$12 sps:$4 sm:$0xff]  }
 0x13c   : > { %1334 = vmatprep.mubr.bf16.mxu0 %v2813_v54  ;;  %1526 = vmatprep.mubr.bf16.mxu1 %v2815_v55  ;;  %v2895_v54 = vld [vmem:[%s3441_s6 + $0x22c] ss:$12 sps:$4 sm:$0xff]  }
 0x13d   : > { %v2897_v55 = vld [vmem:[%s3441_s6 + $0x2d8] ss:$12 sps:$4 sm:$0xff]  }
 0x143   : > { %1335 = vmatmul.mubr.bf16.gmra.mrb[28].mxu0 %v2817_v56  ;;  %1527 = vmatmul.mubr.bf16.gmra.mrb[28].mxu1 %v2818_v57  ;;  %v2898_v56 = vld [vmem:[%s3441_s6 + $0x228] ss:$12 sps:$4 sm:$0xff]   ;;  %v2899_v57 = vld [vmem:[%s3441_s6 + $0x2f0] ss:$12 sps:$4 sm:$0xff]  }
 0x144   : > { %1342 = vmatprep.mubr.bf16.mxu0 %v2820_v58  ;;  %2496 = vmatprep.mubr.bf16.mxu1 %v2822_v59 }
 0x14b   : > { %1343 = vmatmul.mubr.bf16.gmra.mrb[32].mxu0 %v2823_v60  ;;  %2497 = vmatmul.mubr.bf16.vlgmr.msra.gmra.mrb[32].mxu1 %v2824_v61 }
 0x14c   : > { %1350 = vmatprep.mubr.bf16.mxu0 %v2825_v62  ;;  %2500 = vmatprep.mubr.bf16.mxu1 %v2827_v63 }
 0x153   : > { %1351 = vmatmul.mubr.bf16.gmra.mrb[36].mxu0 %v2828_v0  ;;  %2501 = vmatmul.mubr.bf16.gmra.mrb[36].mxu1 %v2829_v1 }
 0x154   : > { %1358 = vmatprep.mubr.bf16.mxu0 %v2830_v2  ;;  %2504 = vmatprep.mubr.bf16.mxu1 %v2832_v3 }
 0x15b   : > { %1359 = vmatmul.mubr.bf16.gmra.mrb[40].mxu0 %v2833_v4  ;;  %2505 = vmatmul.mubr.bf16.gmra.mrb[40].mxu1 %v2834_v5 }
 0x15c   : > { %1366 = vmatprep.mubr.bf16.mxu0 %v2835_v6  ;;  %2508 = vmatprep.mubr.bf16.mxu1 %v2837_v7 }
 0x163   : > { %1367 = vmatmul.mubr.bf16.gmra.mrb[44].mxu0 %v2838_v8  ;;  %2509 = vmatmul.mubr.bf16.gmra.mrb[44].mxu1 %v2839_v9 }
 0x164   : > { %1374 = vmatprep.mubr.bf16.mxu0 %v2840_v10  ;;  %2512 = vmatprep.mubr.bf16.mxu1 %v2842_v11 }
 0x16b   : > { %1375 = vmatmul.mubr.bf16.gmra.mrb[48].mxu0 %v2843_v12  ;;  %2513 = vmatmul.mubr.bf16.gmra.mrb[48].mxu1 %v2844_v13 }
 0x16c   : > { %1382 = vmatprep.mubr.bf16.mxu0 %v2845_v14  ;;  %2516 = vmatprep.mubr.bf16.mxu1 %v2847_v15 }
 0x173   : > { %1383 = vmatmul.mubr.bf16.gmra.mrb[52].mxu0 %v2848_v16  ;;  %2517 = vmatmul.mubr.bf16.gmra.mrb[52].mxu1 %v2849_v17 }
 0x174   : > { %1390 = vmatprep.mubr.bf16.mxu0 %v2850_v18  ;;  %2520 = vmatprep.mubr.bf16.mxu1 %v2852_v19 }
 0x17b   : > { %1391 = vmatmul.mubr.bf16.gmra.mrb[56].mxu0 %v2853_v20  ;;  %2521 = vmatmul.mubr.bf16.gmra.mrb[56].mxu1 %v2854_v21 }
 0x17c   : > { %1398 = vmatprep.mubr.bf16.mxu0 %v2855_v22  ;;  %2524 = vmatprep.mubr.bf16.mxu1 %v2857_v23 }
 0x183   : > { %1399 = vmatmul.mubr.bf16.gmra.mrb[60].mxu0 %v2858_v24  ;;  %2525 = vmatmul.mubr.bf16.gmra.mrb[60].mxu1 %v2859_v25 }
 0x184   : > { %1406 = vmatprep.mubr.bf16.mxu0 %v2860_v26  ;;  %2528 = vmatprep.mubr.bf16.mxu1 %v2862_v27 }
 0x18b   : > { %1407 = vmatmul.mubr.bf16.gmra.mrb[64].mxu0 %v2863_v28  ;;  %2529 = vmatmul.mubr.bf16.gmra.mrb[64].mxu1 %v2864_v29 }
 0x18c   : > { %1414 = vmatprep.mubr.bf16.mxu0 %v2865_v30  ;;  %2532 = vmatprep.mubr.bf16.mxu1 %v2867_v31 }
 0x193   : > { %1415 = vmatmul.mubr.bf16.gmra.mrb[68].mxu0 %v2868_v32  ;;  %2533 = vmatmul.mubr.bf16.gmra.mrb[68].mxu1 %v2869_v33 }
 0x194   : > { %1422 = vmatprep.mubr.bf16.mxu0 %v2870_v34  ;;  %2536 = vmatprep.mubr.bf16.mxu1 %v2872_v35 }
 0x19b   : > { %1423 = vmatmul.mubr.bf16.gmra.mrb[72].mxu0 %v2873_v36  ;;  %2537 = vmatmul.mubr.bf16.gmra.mrb[72].mxu1 %v2874_v37 }
 0x19c   : > { %1430 = vmatprep.mubr.bf16.mxu0 %v2875_v38  ;;  %2540 = vmatprep.mubr.bf16.mxu1 %v2877_v39 }
 0x1a3   : > { %1431 = vmatmul.mubr.bf16.gmra.mrb[76].mxu0 %v2878_v40  ;;  %2541 = vmatmul.mubr.bf16.gmra.mrb[76].mxu1 %v2879_v41 }
 0x1a4   : > { %1438 = vmatprep.mubr.bf16.mxu0 %v2880_v42  ;;  %2544 = vmatprep.mubr.bf16.mxu1 %v2882_v43 }
 0x1ab   : > { %1439 = vmatmul.mubr.bf16.gmra.mrb[80].mxu0 %v2883_v44  ;;  %2545 = vmatmul.mubr.bf16.gmra.mrb[80].mxu1 %v2884_v45 }
 0x1ac   : > { %1446 = vmatprep.mubr.bf16.mxu0 %v2885_v46  ;;  %2548 = vmatprep.mubr.bf16.mxu1 %v2887_v47 }
 0x1b3   : > { %1447 = vmatmul.mubr.bf16.gmra.mrb[84].mxu0 %v2888_v48  ;;  %2549 = vmatmul.mubr.bf16.gmra.mrb[84].mxu1 %v2889_v49 }
 0x1b4   : > { %1454 = vmatprep.mubr.bf16.mxu0 %v2890_v50  ;;  %2552 = vmatprep.mubr.bf16.mxu1 %v2892_v51 }
 0x1bb   : > { %1455 = vmatmul.mubr.bf16.gmra.mrb[88].mxu0 %v2893_v52  ;;  %2553 = vmatmul.mubr.bf16.gmra.mrb[88].mxu1 %v2894_v53 }
 0x1bc   : > { %1462 = vmatprep.mubr.bf16.mxu0 %v2895_v54  ;;  %2556 = vmatprep.mubr.bf16.mxu1 %v2897_v55 }
 0x1c3   : > { %1463 = vmatmul.mubr.bf16.gmra.mrb[92].mxu0 %v2898_v56  ;;  %2557 = vmatmul.mubr.bf16.gmra.mrb[92].mxu1 %v2899_v57 }
 0x1de   : > { %v3681_v58 = vpop.f32.mrb[0].mxu0  ;;  %v3683_v59 = vpop.f32.mrb[0].mxu1 }
 0x1df   : > { %v1282_v60 = vpop.f32.mrb[1].mxu0  ;;  %v1474_v61 = vpop.f32.mrb[1].mxu1 }
 0x1e0   : > { %v3685_v62 = vpop.f32.mrb[2].mxu0  ;;  %v3687_v63 = vpop.f32.mrb[2].mxu1  ;;  %v352_v61 = vld [vmem:[#allocation2 + $0x10] sm:$0xff] }
 0x1e1   : > { %v1285_v0 = vpop.f32.mrb[3].mxu0  ;;  %v1477_v1 = vpop.f32.mrb[3].mxu1 }
 0x1e6   : > { %v1288_v2 = vpop.f32.mrb[4].mxu0  ;;  %v3689_v3 = vpop.f32.mrb[4].mxu1 }
 0x1e7   : > { %v1290_v4 = vpop.f32.mrb[5].mxu0  ;;  %v1482_v5 = vpop.f32.mrb[5].mxu1 }
 0x1e8   : > { %v3691_v6 = vpop.f32.mrb[6].mxu0  ;;  %v3693_v7 = vpop.f32.mrb[6].mxu1  ;;  %v350_v5 = vld [vmem:[#allocation2] sm:$0xff] }
 0x1e9   : > { %v1293_v8 = vpop.f32.mrb[7].mxu0  ;;  %v1485_v9 = vpop.f32.mrb[7].mxu1 }
 0x1ee   : > { %v3695_v10 = vpop.f32.mrb[8].mxu0  ;;  %v3697_v11 = vpop.f32.mrb[8].mxu1 }
 0x1ef   : > { %v1298_v12 = vpop.f32.mrb[9].mxu0  ;;  %v1490_v13 = vpop.f32.mrb[9].mxu1 }
 0x1f0   : > { %v3699_v14 = vpop.f32.mrb[10].mxu0  ;;  %v3701_v15 = vpop.f32.mrb[10].mxu1  ;;  %v353_v13 = vld [vmem:[#allocation2 + $0x18] sm:$0xff] }
 0x1f1   : > { %v1301_v16 = vpop.f32.mrb[11].mxu0  ;;  %v1493_v17 = vpop.f32.mrb[11].mxu1 }
 0x1f6   : > { %v3703_v18 = vpop.f32.mrb[12].mxu0  ;;  %v3705_v19 = vpop.f32.mrb[12].mxu1 }
 0x1f7   : > { %v1306_v20 = vpop.f32.mrb[13].mxu0  ;;  %v1498_v21 = vpop.f32.mrb[13].mxu1 }
 0x1f8   : > { %v3707_v22 = vpop.f32.mrb[14].mxu0  ;;  %v3709_v23 = vpop.f32.mrb[14].mxu1 }
 0x1f9   : > { %v1309_v24 = vpop.f32.mrb[15].mxu0  ;;  %v1501_v25 = vpop.f32.mrb[15].mxu1 }
 0x1fa   : > { %v351_v24 = vld [vmem:[#allocation2 + $0x8] sm:$0xff] }
 0x1fe   : > { %v3711_v26 = vpop.f32.mrb[16].mxu0  ;;  %v3713_v27 = vpop.f32.mrb[16].mxu1 }
 0x1ff   : > { %v1314_v28 = vpop.f32.mrb[17].mxu0  ;;  %v1506_v29 = vpop.f32.mrb[17].mxu1 }
 0x200   : > { %v3715_v30 = vpop.f32.mrb[18].mxu0  ;;  %v3717_v31 = vpop.f32.mrb[18].mxu1 }
 0x201   : > { %v1317_v32 = vpop.f32.mrb[19].mxu0  ;;  %v1509_v33 = vpop.f32.mrb[19].mxu1 }
 0x202   : > { %v356_v33 = vld [vmem:[#allocation2 + $0x30] sm:$0xff] }
 0x206   : > { %v3719_v34 = vpop.f32.mrb[20].mxu0  ;;  %v3721_v35 = vpop.f32.mrb[20].mxu1 }
 0x207   : > { %v1322_v36 = vpop.f32.mrb[21].mxu0  ;;  %v1514_v37 = vpop.f32.mrb[21].mxu1 }
 0x208   : > { %v3723_v38 = vpop.f32.mrb[22].mxu0  ;;  %v3725_v39 = vpop.f32.mrb[22].mxu1 }
 0x209   : > { %v1325_v40 = vpop.f32.mrb[23].mxu0  ;;  %v1517_v41 = vpop.f32.mrb[23].mxu1 }
 0x20e   : > { %v3727_v42 = vpop.f32.mrb[24].mxu0  ;;  %v3729_v43 = vpop.f32.mrb[24].mxu1 }
 0x20f   : > { %v1330_v44 = vpop.f32.mrb[25].mxu0  ;;  %v1522_v45 = vpop.f32.mrb[25].mxu1 }
 0x210   : > { %v3731_v46 = vpop.f32.mrb[26].mxu0  ;;  %v3733_v47 = vpop.f32.mrb[26].mxu1 }
 0x211   : > { %v1333_v48 = vpop.f32.mrb[27].mxu0  ;;  %v1525_v49 = vpop.f32.mrb[27].mxu1 }
 0x216   : > { %v3735_v50 = vpop.f32.mrb[28].mxu0  ;;  %v3737_v51 = vpop.f32.mrb[28].mxu1 }
 0x217   : > { %v1338_v52 = vpop.f32.mrb[29].mxu0  ;;  %v1530_v53 = vpop.f32.mrb[29].mxu1 }
 0x218   : > { %v3739_v54 = vpop.f32.mrb[30].mxu0  ;;  %v3741_v55 = vpop.f32.mrb[30].mxu1 }
 0x219   : > { %v1341_v56 = vpop.f32.mrb[31].mxu0  ;;  %v1533_v57 = vpop.f32.mrb[31].mxu1 }
 0x21a   : > { %v355_v56 = vld [vmem:[#allocation2 + $0x28] sm:$0xff] }
 0x21e   : > { %v3743_v60 = vpop.f32.mrb[32].mxu0  ;;  %v2498_v0 = vpop.f32.mrb[32].mxu1 }
 0x21f   : > { %v1578_v1 = vadd.f32 %v2498_v0, %v1288_v2  ;;  %v1346_v4 = vpop.f32.mrb[33].mxu0  ;;  %v1569_v8 = vpop.f32.mrb[33].mxu1 }
 0x220   : > { %v1570_v9 = vadd.f32 %v1569_v8, %v3681_v58  ;;  %v3746_v12 = vpop.f32.mrb[34].mxu0  ;;  %v2499_v16 = vpop.f32.mrb[34].mxu1  ;;  %v360_v4 = vld [vmem:[#allocation2 + $0x50] sm:$0xff] }
 0x221   : > { %v1826_v17 = vadd.f32 %v1578_v1, %v352_v61  ;;  %v1581_v20 = vadd.f32 %v2499_v16, %v3691_v6  ;;  %v1349_v21 = vpop.f32.mrb[35].mxu0  ;;  %v1572_v25 = vpop.f32.mrb[35].mxu1  ;;  %v354_v6 = vld [vmem:[#allocation2 + $0x20] sm:$0xff] }
 0x222   : > { %v1824_v28 = vadd.f32 %v1570_v9, %v350_v5  ;;  %v1573_v29 = vadd.f32 %v1572_v25, %v3685_v62  ;;  %v357_v62 = vld [vmem:[#allocation2 + $0x38] sm:$0xff] }
 0x223   : > { %1890 = vst [vmem:[#allocation2 + $0x10] sm:$0xff] %v1826_v17  ;;  %v1827_v2 = vadd.f32 %v1581_v20, %v353_v13 }
 0x224   : > { %1888 = vst [vmem:[#allocation2] sm:$0xff] %v1824_v28  ;;  %v1825_v32 = vadd.f32 %v1573_v29, %v351_v24  ;;  %v359_v28 = vld [vmem:[#allocation2 + $0x48] sm:$0xff] }
 0x225   : > { %1891 = vst [vmem:[#allocation2 + $0x18] sm:$0xff] %v1827_v2 }
 0x226   : > { %1889 = vst [vmem:[#allocation2 + $0x8] sm:$0xff] %v1825_v32  ;;  %v3750_v58 = vpop.f32.mrb[36].mxu0  ;;  %v2502_v36 = vpop.f32.mrb[36].mxu1 }
 0x227   : > { %v1594_v37 = vadd.f32 %v2502_v36, %v3703_v18  ;;  %v1354_v40 = vpop.f32.mrb[37].mxu0  ;;  %v1585_v41 = vpop.f32.mrb[37].mxu1  ;;  %v364_v36 = vld [vmem:[#allocation2 + $0x70] sm:$0xff] }
 0x228   : > { %v1586_v44 = vadd.f32 %v1585_v41, %v3695_v10  ;;  %v3754_v45 = vpop.f32.mrb[38].mxu0  ;;  %v2503_v48 = vpop.f32.mrb[38].mxu1  ;;  %v362_v41 = vld [vmem:[#allocation2 + $0x60] sm:$0xff] }
 0x229   : > { %v1830_v49 = vadd.f32 %v1594_v37, %v356_v33  ;;  %v1597_v52 = vadd.f32 %v2503_v48, %v3707_v22  ;;  %v1357_v53 = vpop.f32.mrb[39].mxu0  ;;  %v1588_v57 = vpop.f32.mrb[39].mxu1  ;;  %v358_v22 = vld [vmem:[#allocation2 + $0x40] sm:$0xff]  ;;  %v365_v48 = vld [vmem:[#allocation2 + $0x78] sm:$0xff] }
 0x22a   : > { %v1828_v61 = vadd.f32 %v1586_v44, %v354_v6  ;;  %v1589_v0 = vadd.f32 %v1588_v57, %v3699_v14  ;;  %v361_v14 = vld [vmem:[#allocation2 + $0x58] sm:$0xff] }
 0x22b   : > { %1894 = vst [vmem:[#allocation2 + $0x30] sm:$0xff] %v1830_v49  ;;  %v1831_v18 = vadd.f32 %v1597_v52, %v357_v62 }
 0x22c   : > { %1892 = vst [vmem:[#allocation2 + $0x20] sm:$0xff] %v1828_v61  ;;  %v1829_v1 = vadd.f32 %v1589_v0, %v355_v56  ;;  %v363_v56 = vld [vmem:[#allocation2 + $0x68] sm:$0xff] }
 0x22d   : > { %1895 = vst [vmem:[#allocation2 + $0x38] sm:$0xff] %v1831_v18 }
 0x22e   : > { %1893 = vst [vmem:[#allocation2 + $0x28] sm:$0xff] %v1829_v1  ;;  %v3758_v10 = vpop.f32.mrb[40].mxu0  ;;  %v2506_v5 = vpop.f32.mrb[40].mxu1 }
 0x22f   : > { %v1610_v8 = vadd.f32 %v2506_v5, %v3719_v34  ;;  %v1362_v9 = vpop.f32.mrb[41].mxu0  ;;  %v1601_v13 = vpop.f32.mrb[41].mxu1 }
 0x230   : > { %v1602_v16 = vadd.f32 %v1601_v13, %v3711_v26  ;;  %v3762_v17 = vpop.f32.mrb[42].mxu0  ;;  %v2507_v20 = vpop.f32.mrb[42].mxu1  ;;  %v366_v9 = vld [vmem:[#allocation2 + $0x80] sm:$0xff] }
 0x231   : > { %v1834_v21 = vadd.f32 %v1610_v8, %v360_v4  ;;  %v1613_v24 = vadd.f32 %v2507_v20, %v3723_v38  ;;  %v1365_v25 = vpop.f32.mrb[43].mxu0  ;;  %v1604_v29 = vpop.f32.mrb[43].mxu1 }
 0x232   : > { %v1832_v2 = vadd.f32 %v1602_v16, %v358_v22  ;;  %v1605_v32 = vadd.f32 %v1604_v29, %v3715_v30  ;;  %v369_v16 = vld [vmem:[#allocation2 + $0x98] sm:$0xff] }
 0x233   : > { %1898 = vst [vmem:[#allocation2 + $0x50] sm:$0xff] %v1834_v21  ;;  %v1835_v34 = vadd.f32 %v1613_v24, %v361_v14  ;;  %v367_v24 = vld [vmem:[#allocation2 + $0x88] sm:$0xff] }
 0x234   : > { %1896 = vst [vmem:[#allocation2 + $0x40] sm:$0xff] %v1832_v2  ;;  %v1833_v33 = vadd.f32 %v1605_v32, %v359_v28 }
 0x235   : > { %1899 = vst [vmem:[#allocation2 + $0x58] sm:$0xff] %v1835_v34 }
 0x236   : > { %1897 = vst [vmem:[#allocation2 + $0x48] sm:$0xff] %v1833_v33  ;;  %v1368_v26 = vpop.f32.mrb[44].mxu0  ;;  %v2510_v37 = vpop.f32.mrb[44].mxu1 }
 0x237   : > { %v1626_v40 = vadd.f32 %v2510_v37, %v3735_v50  ;;  %v1370_v6 = vpop.f32.mrb[45].mxu0  ;;  %v1617_v38 = vpop.f32.mrb[45].mxu1  ;;  %v370_v37 = vld [vmem:[#allocation2 + $0xa0] sm:$0xff] }
 0x238   : > { %v1618_v44 = vadd.f32 %v1617_v38, %v3727_v42  ;;  %v1371_v62 = vpop.f32.mrb[46].mxu0  ;;  %v2511_v49 = vpop.f32.mrb[46].mxu1  ;;  %v368_v42 = vld [vmem:[#allocation2 + $0x90] sm:$0xff] }
 0x239   : > { %v1838_v30 = vadd.f32 %v1626_v40, %v364_v36  ;;  %v1629_v52 = vadd.f32 %v2511_v49, %v3739_v54  ;;  %v1373_v53 = vpop.f32.mrb[47].mxu0  ;;  %v1620_v57 = vpop.f32.mrb[47].mxu1  ;;  %v371_v49 = vld [vmem:[#allocation2 + $0xa8] sm:$0xff] }
 0x23a   : > { %v1836_v61 = vadd.f32 %v1618_v44, %v362_v41  ;;  %v1621_v0 = vadd.f32 %v1620_v57, %v3731_v46  ;;  %v373_v41 = vld [vmem:[#allocation2 + $0xb8] sm:$0xff] }
 0x23b   : > { %1902 = vst [vmem:[#allocation2 + $0x70] sm:$0xff] %v1838_v30  ;;  %v1839_v18 = vadd.f32 %v1629_v52, %v365_v48 }
 0x23c   : > { %1900 = vst [vmem:[#allocation2 + $0x60] sm:$0xff] %v1836_v61  ;;  %v1837_v50 = vadd.f32 %v1621_v0, %v363_v56  ;;  %v376_v61 = vld [vmem:[#allocation2 + $0xd0] sm:$0xff] }
 0x23d   : > { %1903 = vst [vmem:[#allocation2 + $0x78] sm:$0xff] %v1839_v18 }
 0x23e   : > { %1901 = vst [vmem:[#allocation2 + $0x68] sm:$0xff] %v1837_v50  ;;  %v1376_v1 = vpop.f32.mrb[48].mxu0  ;;  %v2514_v4 = vpop.f32.mrb[48].mxu1  ;;  %v374_v50 = vld [vmem:[#allocation2 + $0xc0] sm:$0xff] }
 0x23f   : > { %v1642_v5 = vadd.f32 %v2514_v4, %v3750_v58  ;;  %v1378_v8 = vpop.f32.mrb[49].mxu0  ;;  %v1633_v54 = vpop.f32.mrb[49].mxu1 }
 0x240   : > { %v1634_v22 = vadd.f32 %v1633_v54, %v3743_v60  ;;  %v1379_v13 = vpop.f32.mrb[50].mxu0  ;;  %v2515_v14 = vpop.f32.mrb[50].mxu1  ;;  %v372_v60 = vld [vmem:[#allocation2 + $0xb0] sm:$0xff] }
 0x241   : > { %v1842_v46 = vadd.f32 %v1642_v5, %v368_v42  ;;  %v1645_v20 = vadd.f32 %v2515_v14, %v3754_v45  ;;  %v1381_v21 = vpop.f32.mrb[51].mxu0  ;;  %v1636_v25 = vpop.f32.mrb[51].mxu1  ;;  %v377_v5 = vld [vmem:[#allocation2 + $0xd8] sm:$0xff] }
 0x242   : > { %v1840_v28 = vadd.f32 %v1634_v22, %v366_v9  ;;  %v1637_v29 = vadd.f32 %v1636_v25, %v3746_v12  ;;  %v375_v22 = vld [vmem:[#allocation2 + $0xc8] sm:$0xff]  ;;  %v380_v25 = vld [vmem:[#allocation2 + $0xf0] sm:$0xff] }
 0x243   : > { %1906 = vst [vmem:[#allocation2 + $0x90] sm:$0xff] %v1842_v46  ;;  %v1843_v2 = vadd.f32 %v1645_v20, %v369_v16 }
 0x244   : > { %1904 = vst [vmem:[#allocation2 + $0x80] sm:$0xff] %v1840_v28  ;;  %v1841_v58 = vadd.f32 %v1637_v29, %v367_v24 }
 0x245   : > { %1907 = vst [vmem:[#allocation2 + $0x98] sm:$0xff] %v1843_v2  ;;  %v378_v2 = vld [vmem:[#allocation2 + $0xe0] sm:$0xff] }
 0x246   : > { %1905 = vst [vmem:[#allocation2 + $0x88] sm:$0xff] %v1841_v58  ;;  %v1384_v32 = vpop.f32.mrb[52].mxu0  ;;  %v2518_v34 = vpop.f32.mrb[52].mxu1 }
 0x247   : > { %v1658_v33 = vadd.f32 %v2518_v34, %v1368_v26  ;;  %v1386_v36 = vpop.f32.mrb[53].mxu0  ;;  %v1649_v40 = vpop.f32.mrb[53].mxu1  ;;  %v381_v34 = vld [vmem:[#allocation2 + $0xf8] sm:$0xff] }
 0x248   : > { %v1650_v45 = vadd.f32 %v1649_v40, %v3758_v10  ;;  %v1387_v6 = vpop.f32.mrb[54].mxu0  ;;  %v2519_v38 = vpop.f32.mrb[54].mxu1  ;;  %v379_v40 = vld [vmem:[#allocation2 + $0xe8] sm:$0xff] }
 0x249   : > { %v1846_v44 = vadd.f32 %v1658_v33, %v372_v60  ;;  %v1661_v12 = vadd.f32 %v2519_v38, %v1371_v62  ;;  %v1389_v48 = vpop.f32.mrb[55].mxu0  ;;  %v1652_v30 = vpop.f32.mrb[55].mxu1 }
 0x24a   : > { %v1844_v52 = vadd.f32 %v1650_v45, %v370_v37  ;;  %v1653_v53 = vadd.f32 %v1652_v30, %v3762_v17  ;;  %v382_v30 = vld [vmem:[#allocation2 + $0x100] sm:$0xff] }
 0x24b   : > { %1910 = vst [vmem:[#allocation2 + $0xb0] sm:$0xff] %v1846_v44  ;;  %v1847_v56 = vadd.f32 %v1661_v12, %v373_v41 }
 0x24c   : > { %1908 = vst [vmem:[#allocation2 + $0xa0] sm:$0xff] %v1844_v52  ;;  %v1845_v26 = vadd.f32 %v1653_v53, %v371_v49 }
 0x24d   : > { %1911 = vst [vmem:[#allocation2 + $0xb8] sm:$0xff] %v1847_v56 }
 0x24e   : > { %1909 = vst [vmem:[#allocation2 + $0xa8] sm:$0xff] %v1845_v26  ;;  %v1392_v57 = vpop.f32.mrb[56].mxu0  ;;  %v2522_v10 = vpop.f32.mrb[56].mxu1 }
 0x24f   : > { %v1674_v0 = vadd.f32 %v2522_v10, %v1384_v32  ;;  %v1394_v18 = vpop.f32.mrb[57].mxu0  ;;  %v1665_v42 = vpop.f32.mrb[57].mxu1 }
 0x250   : > { %v1666_v62 = vadd.f32 %v1665_v42, %v1376_v1  ;;  %v1395_v4 = vpop.f32.mrb[58].mxu0  ;;  %v2523_v8 = vpop.f32.mrb[58].mxu1  ;;  %v384_v42 = vld [vmem:[#allocation2 + $0x110] sm:$0xff] }
 0x251   : > { %v1850_v9 = vadd.f32 %v1674_v0, %v376_v61  ;;  %v1677_v54 = vadd.f32 %v2523_v8, %v1387_v6  ;;  %v1397_v17 = vpop.f32.mrb[59].mxu0  ;;  %v1668_v16 = vpop.f32.mrb[59].mxu1  ;;  %v383_v61 = vld [vmem:[#allocation2 + $0x108] sm:$0xff] }
 0x252   : > { %v1848_v14 = vadd.f32 %v1666_v62, %v374_v50  ;;  %v1669_v46 = vadd.f32 %v1668_v16, %v1379_v13 }
 0x253   : > { %1914 = vst [vmem:[#allocation2 + $0xd0] sm:$0xff] %v1850_v9  ;;  %v1851_v20 = vadd.f32 %v1677_v54, %v377_v5  ;;  %v385_v54 = vld [vmem:[#allocation2 + $0x118] sm:$0xff] }
 0x254   : > { %1912 = vst [vmem:[#allocation2 + $0xc0] sm:$0xff] %v1848_v14  ;;  %v1849_v21 = vadd.f32 %v1669_v46, %v375_v22 }
 0x255   : > { %1915 = vst [vmem:[#allocation2 + $0xd8] sm:$0xff] %v1851_v20 }
 0x256   : > { %1913 = vst [vmem:[#allocation2 + $0xc8] sm:$0xff] %v1849_v21  ;;  %v1400_v24 = vpop.f32.mrb[60].mxu0  ;;  %v2526_v28 = vpop.f32.mrb[60].mxu1 }
 0x257   : > { %v1690_v1 = vadd.f32 %v2526_v28, %v1400_v24  ;;  %v1402_v29 = vpop.f32.mrb[61].mxu0  ;;  %v1681_v58 = vpop.f32.mrb[61].mxu1  ;;  %v386_v24 = vld [vmem:[#allocation2 + $0x120] sm:$0xff] }
 0x258   : > { %v1682_v32 = vadd.f32 %v1681_v58, %v1392_v57  ;;  %v1403_v60 = vpop.f32.mrb[62].mxu0  ;;  %v2527_v33 = vpop.f32.mrb[62].mxu1  ;;  %v387_v58 = vld [vmem:[#allocation2 + $0x128] sm:$0xff] }
 0x259   : > { %v1854_v36 = vadd.f32 %v1690_v1, %v380_v25  ;;  %v1693_v37 = vadd.f32 %v2527_v33, %v1403_v60  ;;  %v1405_v13 = vpop.f32.mrb[63].mxu0  ;;  %v1684_v45 = vpop.f32.mrb[63].mxu1 }
 0x25a   : > { %v1852_v6 = vadd.f32 %v1682_v32, %v378_v2  ;;  %v1685_v41 = vadd.f32 %v1684_v45, %v1395_v4 }
 0x25b   : > { %1918 = vst [vmem:[#allocation2 + $0xf0] sm:$0xff] %v1854_v36  ;;  %v1855_v38 = vadd.f32 %v1693_v37, %v381_v34 }
 0x25c   : > { %1916 = vst [vmem:[#allocation2 + $0xe0] sm:$0xff] %v1852_v6  ;;  %v1853_v44 = vadd.f32 %v1685_v41, %v379_v40  ;;  %v388_v40 = vld [vmem:[#allocation2 + $0x130] sm:$0xff] }
 0x25d   : > { %1919 = vst [vmem:[#allocation2 + $0xf8] sm:$0xff] %v1855_v38 }
 0x25e   : > { %1917 = vst [vmem:[#allocation2 + $0xe8] sm:$0xff] %v1853_v44  ;;  %v1408_v12 = vpop.f32.mrb[64].mxu0  ;;  %v2530_v48 = vpop.f32.mrb[64].mxu1 }
 0x25f   : > { %v1410_v49 = vpop.f32.mrb[65].mxu0  ;;  %v1697_v52 = vpop.f32.mrb[65].mxu1 }
 0x260   : > { %v1698_v53 = vadd.f32 %v1697_v52, %v1408_v12  ;;  %v1411_v56 = vpop.f32.mrb[66].mxu0  ;;  %v2531_v26 = vpop.f32.mrb[66].mxu1  ;;  %v389_v12 = vld [vmem:[#allocation2 + $0x138] sm:$0xff] }
 0x261   : > { %v1413_v57 = vpop.f32.mrb[67].mxu0  ;;  %v1700_v10 = vpop.f32.mrb[67].mxu1 }
 0x262   : > { %v1856_v0 = vadd.f32 %v1698_v53, %v382_v30  ;;  %v1701_v18 = vadd.f32 %v1700_v10, %v1411_v56  ;;  %v390_v57 = vld [vmem:[#allocation2 + $0x140] sm:$0xff]  ;;  %v400_v10 = vld [vmem:[#allocation2 + $0x190] sm:$0xff] }
 0x264   : > { %1920 = vst [vmem:[#allocation2 + $0x100] sm:$0xff] %v1856_v0  ;;  %v1857_v50 = vadd.f32 %v1701_v18, %v383_v61 }
 0x266   : > { %1921 = vst [vmem:[#allocation2 + $0x108] sm:$0xff] %v1857_v50  ;;  %v1416_v62 = vpop.f32.mrb[68].mxu0  ;;  %v2534_v4 = vpop.f32.mrb[68].mxu1 }
 0x267   : > { %v1706_v5 = vadd.f32 %v2530_v48, %v1416_v62  ;;  %v1418_v8 = vpop.f32.mrb[69].mxu0  ;;  %v1713_v9 = vpop.f32.mrb[69].mxu1  ;;  %v398_v62 = vld [vmem:[#allocation2 + $0x180] sm:$0xff] }
 0x268   : > { %v1419_v17 = vpop.f32.mrb[70].mxu0  ;;  %v2535_v22 = vpop.f32.mrb[70].mxu1  ;;  %v391_v8 = vld [vmem:[#allocation2 + $0x148] sm:$0xff] }
 0x269   : > { %v1858_v16 = vadd.f32 %v1706_v5, %v384_v42  ;;  %v1709_v14 = vadd.f32 %v2531_v26, %v1419_v17  ;;  %v1421_v46 = vpop.f32.mrb[71].mxu0  ;;  %v1716_v20 = vpop.f32.mrb[71].mxu1 }
 0x26b   : > { %1922 = vst [vmem:[#allocation2 + $0x110] sm:$0xff] %v1858_v16  ;;  %v1859_v21 = vadd.f32 %v1709_v14, %v385_v54  ;;  %v401_v54 = vld [vmem:[#allocation2 + $0x198] sm:$0xff] }
 0x26d   : > { %1923 = vst [vmem:[#allocation2 + $0x118] sm:$0xff] %v1859_v21  ;;  %v399_v21 = vld [vmem:[#allocation2 + $0x188] sm:$0xff] }
 0x26e   : > { %v1424_v25 = vpop.f32.mrb[72].mxu0  ;;  %v3776_v28 = vpop.f32.mrb[72].mxu1 }
 0x26f   : > { %v1714_v1 = vadd.f32 %v1713_v9, %v1424_v25  ;;  %v1426_v29 = vpop.f32.mrb[73].mxu0  ;;  %v1729_v2 = vpop.f32.mrb[73].mxu1 }
 0x270   : > { %v1427_v32 = vpop.f32.mrb[74].mxu0  ;;  %v3778_v60 = vpop.f32.mrb[74].mxu1 }
 0x271   : > { %v1860_v34 = vadd.f32 %v1714_v1, %v386_v24  ;;  %v1717_v33 = vadd.f32 %v1716_v20, %v1427_v32  ;;  %v1429_v36 = vpop.f32.mrb[75].mxu0  ;;  %v1732_v37 = vpop.f32.mrb[75].mxu1  ;;  %v404_v32 = vld [vmem:[#allocation2 + $0x1b0] sm:$0xff] }
 0x273   : > { %1924 = vst [vmem:[#allocation2 + $0x120] sm:$0xff] %v1860_v34  ;;  %v1861_v13 = vadd.f32 %v1717_v33, %v387_v58 }
 0x275   : > { %1925 = vst [vmem:[#allocation2 + $0x128] sm:$0xff] %v1861_v13 }
 0x276   : > { %v1432_v45 = vpop.f32.mrb[76].mxu0  ;;  %v3780_v6 = vpop.f32.mrb[76].mxu1 }
 0x277   : > { %v1722_v41 = vadd.f32 %v2534_v4, %v1432_v45  ;;  %v1434_v38 = vpop.f32.mrb[77].mxu0  ;;  %v3782_v44 = vpop.f32.mrb[77].mxu1 }
 0x278   : > { %v1435_v48 = vpop.f32.mrb[78].mxu0  ;;  %v3784_v49 = vpop.f32.mrb[78].mxu1 }
 0x279   : > { %v1862_v30 = vadd.f32 %v1722_v41, %v388_v40  ;;  %v1725_v52 = vadd.f32 %v2535_v22, %v1435_v48  ;;  %v1437_v53 = vpop.f32.mrb[79].mxu0  ;;  %v3786_v56 = vpop.f32.mrb[79].mxu1  ;;  %v393_v40 = vld [vmem:[#allocation2 + $0x158] sm:$0xff] }
 0x27a   : > { %v405_v41 = vld [vmem:[#allocation2 + $0x1b8] sm:$0xff] }
 0x27b   : > { %1926 = vst [vmem:[#allocation2 + $0x130] sm:$0xff] %v1862_v30  ;;  %v1863_v26 = vadd.f32 %v1725_v52, %v389_v12 }
 0x27d   : > { %1927 = vst [vmem:[#allocation2 + $0x138] sm:$0xff] %v1863_v26  ;;  %v403_v26 = vld [vmem:[#allocation2 + $0x1a8] sm:$0xff] }
 0x27e   : > { %v1440_v61 = vpop.f32.mrb[80].mxu0  ;;  %v2546_v0 = vpop.f32.mrb[80].mxu1 }
 0x27f   : > { %v1730_v18 = vadd.f32 %v1729_v2, %v1440_v61  ;;  %v1770_v50 = vadd.f32 %v2546_v0, %v3689_v3  ;;  %v1442_v42 = vpop.f32.mrb[81].mxu0  ;;  %v1761_v4 = vpop.f32.mrb[81].mxu1  ;;  %v392_v2 = vld [vmem:[#allocation2 + $0x150] sm:$0xff]  ;;  %v394_v0 = vld [vmem:[#allocation2 + $0x160] sm:$0xff] }
 0x280   : > { %v1762_v5 = vadd.f32 %v1761_v4, %v3683_v59  ;;  %v1443_v9 = vpop.f32.mrb[82].mxu0  ;;  %v2547_v17 = vpop.f32.mrb[82].mxu1  ;;  %v406_v4 = vld [vmem:[#allocation2 + $0x1c0] sm:$0xff] }
 0x281   : > { %v1864_v22 = vadd.f32 %v1730_v18, %v390_v57  ;;  %v1874_v16 = vadd.f32 %v1770_v50, %v400_v10  ;;  %v1733_v14 = vadd.f32 %v1732_v37, %v1443_v9  ;;  %v1773_v46 = vadd.f32 %v2547_v17, %v3693_v7  ;;  %v1445_v20 = vpop.f32.mrb[83].mxu0  ;;  %v1764_v24 = vpop.f32.mrb[83].mxu1  ;;  %v402_v37 = vld [vmem:[#allocation2 + $0x1a0] sm:$0xff] }
 0x282   : > { %v1872_v25 = vadd.f32 %v1762_v5, %v398_v62  ;;  %v1765_v3 = vadd.f32 %v1764_v24, %v3687_v63 }
 0x283   : > { %1928 = vst [vmem:[#allocation2 + $0x140] sm:$0xff] %v1864_v22  ;;  %1938 = vst [vmem:[#allocation2 + $0x190] sm:$0xff] %v1874_v16  ;;  %v1865_v1 = vadd.f32 %v1733_v14, %v391_v8  ;;  %v1875_v29 = vadd.f32 %v1773_v46, %v401_v54  ;;  %v395_v8 = vld [vmem:[#allocation2 + $0x168] sm:$0xff]  ;;  %v409_v54 = vld [vmem:[#allocation2 + $0x1d8] sm:$0xff] }
 0x284   : > { %1936 = vst [vmem:[#allocation2 + $0x180] sm:$0xff] %v1872_v25  ;;  %v1873_v59 = vadd.f32 %v1765_v3, %v399_v21  ;;  %v407_v21 = vld [vmem:[#allocation2 + $0x1c8] sm:$0xff] }
 0x285   : > { %1929 = vst [vmem:[#allocation2 + $0x148] sm:$0xff] %v1865_v1  ;;  %1939 = vst [vmem:[#allocation2 + $0x198] sm:$0xff] %v1875_v29  ;;  %v396_v1 = vld [vmem:[#allocation2 + $0x170] sm:$0xff] }
 0x286   : > { %1937 = vst [vmem:[#allocation2 + $0x188] sm:$0xff] %v1873_v59  ;;  %v1448_v58 = vpop.f32.mrb[84].mxu0  ;;  %v2550_v34 = vpop.f32.mrb[84].mxu1 }
 0x287   : > { %v1738_v7 = vadd.f32 %v3776_v28, %v1448_v58  ;;  %v1786_v33 = vadd.f32 %v2550_v34, %v3705_v19  ;;  %v1450_v36 = vpop.f32.mrb[85].mxu0  ;;  %v1777_v63 = vpop.f32.mrb[85].mxu1 }
 0x288   : > { %v1778_v13 = vadd.f32 %v1777_v63, %v3697_v11  ;;  %v1451_v45 = vpop.f32.mrb[86].mxu0  ;;  %v2551_v38 = vpop.f32.mrb[86].mxu1  ;;  %v413_v36 = vld [vmem:[#allocation2 + $0x1f8] sm:$0xff] }
 0x289   : > { %v1866_v12 = vadd.f32 %v1738_v7, %v392_v2  ;;  %v1878_v48 = vadd.f32 %v1786_v33, %v404_v32  ;;  %v1741_v30 = vadd.f32 %v3778_v60, %v1451_v45  ;;  %v1789_v52 = vadd.f32 %v2551_v38, %v3709_v23  ;;  %v1453_v53 = vpop.f32.mrb[87].mxu0  ;;  %v1780_v28 = vpop.f32.mrb[87].mxu1  ;;  %v408_v60 = vld [vmem:[#allocation2 + $0x1d0] sm:$0xff]  ;;  %v410_v32 = vld [vmem:[#allocation2 + $0x1e0] sm:$0xff]  ;;  %v397_v7 = vld [vmem:[#allocation2 + $0x178] sm:$0xff] }
 0x28a   : > { %v1876_v57 = vadd.f32 %v1778_v13, %v402_v37  ;;  %v1781_v19 = vadd.f32 %v1780_v28, %v3701_v15  ;;  %v411_v38 = vld [vmem:[#allocation2 + $0x1e8] sm:$0xff]  ;;  %v1959_v28 = vld [vmem:[#allocation2 + $0x18] sm:$0xff] (!%p2431_p12) }
 0x28b   : > { %1930 = vst [vmem:[#allocation2 + $0x150] sm:$0xff] %v1866_v12  ;;  %1942 = vst [vmem:[#allocation2 + $0x1b0] sm:$0xff] %v1878_v48  ;;  %v1867_v61 = vadd.f32 %v1741_v30, %v393_v40  ;;  %v1879_v11 = vadd.f32 %v1789_v52, %v405_v41  ;;  %v1957_v52 = vld [vmem:[#allocation2 + $0x8] sm:$0xff] (!%p2431_p12) }
 0x28c   : > { %1940 = vst [vmem:[#allocation2 + $0x1a0] sm:$0xff] %v1876_v57  ;;  %v1877_v10 = vadd.f32 %v1781_v19, %v403_v26  ;;  %v1958_v26 = vld [vmem:[#allocation2 + $0x10] sm:$0xff] (!%p2431_p12)  ;;  %v1960_v57 = vld [vmem:[#allocation2 + $0x20] sm:$0xff] (!%p2431_p12) }
 0x28d   : > { %1931 = vst [vmem:[#allocation2 + $0x158] sm:$0xff] %v1867_v61  ;;  %1943 = vst [vmem:[#allocation2 + $0x1b8] sm:$0xff] %v1879_v11 }
 0x28e   : > { %1941 = vst [vmem:[#allocation2 + $0x1a8] sm:$0xff] %v1877_v10  ;;  %v1456_v18 = vpop.f32.mrb[88].mxu0  ;;  %v2554_v50 = vpop.f32.mrb[88].mxu1  ;;  %v1961_v10 = vld [vmem:[#allocation2 + $0x28] sm:$0xff] (!%p2431_p12) }
 0x28f   : > { %v1746_v23 = vadd.f32 %v3782_v44, %v1456_v18  ;;  %v1802_v42 = vadd.f32 %v2554_v50, %v3721_v35  ;;  %v1458_v62 = vpop.f32.mrb[89].mxu0  ;;  %v1793_v15 = vpop.f32.mrb[89].mxu1  ;;  %v1963_v18 = vld [vmem:[#allocation2 + $0x38] sm:$0xff] (!%p2431_p12) }
 0x290   : > { %v1794_v5 = vadd.f32 %v1793_v15, %v3713_v27  ;;  %v1459_v9 = vpop.f32.mrb[90].mxu0  ;;  %v2555_v17 = vpop.f32.mrb[90].mxu1  ;;  %v1965_v62 = vld [vmem:[#allocation2 + $0x48] sm:$0xff] (!%p2431_p12) }
 0x291   : > { %v1868_v22 = vadd.f32 %v1746_v23, %v394_v0  ;;  %v1882_v16 = vadd.f32 %v1802_v42, %v408_v60  ;;  %v1749_v14 = vadd.f32 %v3786_v56, %v1459_v9  ;;  %v1805_v46 = vadd.f32 %v2555_v17, %v3725_v39  ;;  %v1461_v20 = vpop.f32.mrb[91].mxu0  ;;  %v1796_v44 = vpop.f32.mrb[91].mxu1  ;;  %v412_v56 = vld [vmem:[#allocation2 + $0x1f0] sm:$0xff]  ;;  %v1964_v42 = vld [vmem:[#allocation2 + $0x40] sm:$0xff] (!%p2431_p12)  ;;  %v1967_v9 = vld [vmem:[#allocation2 + $0x58] sm:$0xff] (!%p2431_p12) }
 0x292   : > { %v1880_v24 = vadd.f32 %v1794_v5, %v406_v4  ;;  %v1797_v35 = vadd.f32 %v1796_v44, %v3717_v31  ;;  %v1962_v0 = vld [vmem:[#allocation2 + $0x30] sm:$0xff] (!%p2431_p12)  ;;  %v1969_v17 = vld [vmem:[#allocation2 + $0x68] sm:$0xff] (!%p2431_p12)  ;;  %v1971_v20 = vld [vmem:[#allocation2 + $0x78] sm:$0xff] (!%p2431_p12) }
 0x293   : > { %1932 = vst [vmem:[#allocation2 + $0x160] sm:$0xff] %v1868_v22  ;;  %1946 = vst [vmem:[#allocation2 + $0x1d0] sm:$0xff] %v1882_v16  ;;  %v1869_v25 = vadd.f32 %v1749_v14, %v395_v8  ;;  %v1883_v27 = vadd.f32 %v1805_v46, %v409_v54  ;;  %v1966_v4 = vld [vmem:[#allocation2 + $0x50] sm:$0xff] (!%p2431_p12)  ;;  %v1968_v54 = vld [vmem:[#allocation2 + $0x60] sm:$0xff] (!%p2431_p12) }
 0x294   : > { %1944 = vst [vmem:[#allocation2 + $0x1c0] sm:$0xff] %v1880_v24  ;;  %v1881_v3 = vadd.f32 %v1797_v35, %v407_v21  ;;  %v1970_v46 = vld [vmem:[#allocation2 + $0x70] sm:$0xff] (!%p2431_p12)  ;;  %v1972_v21 = vld [vmem:[#allocation2 + $0x80] sm:$0xff] (!%p2431_p12) }
 0x295   : > { %1933 = vst [vmem:[#allocation2 + $0x168] sm:$0xff] %v1869_v25  ;;  %1947 = vst [vmem:[#allocation2 + $0x1d8] sm:$0xff] %v1883_v27  ;;  %v1973_v25 = vld [vmem:[#allocation2 + $0x88] sm:$0xff] (!%p2431_p12)  ;;  %v1974_v27 = vld [vmem:[#allocation2 + $0x90] sm:$0xff] (!%p2431_p12) }
 0x296   : > { %1945 = vst [vmem:[#allocation2 + $0x1c8] sm:$0xff] %v1881_v3  ;;  %v1464_v29 = vpop.f32.mrb[92].mxu0  ;;  %v2558_v59 = vpop.f32.mrb[92].mxu1  ;;  %v1975_v3 = vld [vmem:[#allocation2 + $0x98] sm:$0xff] (!%p2431_p12) }
 0x297   : > { %v1754_v39 = vadd.f32 %v3780_v6, %v1464_v29  ;;  %v1818_v2 = vadd.f32 %v2558_v59, %v3737_v51  ;;  %v1466_v58 = vpop.f32.mrb[93].mxu0  ;;  %v1809_v31 = vpop.f32.mrb[93].mxu1  ;;  %v1976_v59 = vld [vmem:[#allocation2 + $0xa0] sm:$0xff] (!%p2431_p12) }
 0x298   : > { %v1810_v34 = vadd.f32 %v1809_v31, %v3729_v43  ;;  %v1467_v33 = vpop.f32.mrb[94].mxu0  ;;  %v2559_v37 = vpop.f32.mrb[94].mxu1  ;;  %1955 = sbr.rel (%p2431_p12) target bundleno = 703 (0x2bf), region = 52 }
 0x299   : > { %v1870_v63 = vadd.f32 %v1754_v39, %v396_v1  ;;  %v1886_v13 = vadd.f32 %v1818_v2, %v412_v56  ;;  %v1757_v40 = vadd.f32 %v3784_v49, %v1467_v33  ;;  %v1821_v45 = vadd.f32 %v2559_v37, %v3741_v55  ;;  %v1469_v41 = vpop.f32.mrb[95].mxu0  ;;  %v1812_v6 = vpop.f32.mrb[95].mxu1  ;;  %v1956_v49 = vld [vmem:[#allocation2] sm:$0xff] (!%p2431_p12)  ;;  %v1977_v39 = vld [vmem:[#allocation2 + $0xa8] sm:$0xff] (!%p2431_p12)  ;;  %v1978_v2 = vld [vmem:[#allocation2 + $0xb0] sm:$0xff] (!%p2431_p12) }
 0x29a   : > { %v1884_v12 = vadd.f32 %v1810_v34, %v410_v32  ;;  %v1813_v51 = vadd.f32 %v1812_v6, %v3733_v47  ;;  %v3811_v55 = vld [vmem:[#allocation8] ss:$0 sm:$0xff] (!%p2431_p12)  ;;  %v1979_v34 = vld [vmem:[#allocation2 + $0xb8] sm:$0xff] (!%p2431_p12)  ;;  %v1981_v33 = vld [vmem:[#allocation2 + $0xc8] sm:$0xff] (!%p2431_p12) }
 0x29b   : > { %1934 = vst [vmem:[#allocation2 + $0x170] sm:$0xff] %v1870_v63  ;;  %1950 = vst [vmem:[#allocation2 + $0x1f0] sm:$0xff] %v1886_v13  ;;  %v1871_v48 = vadd.f32 %v1757_v40, %v397_v7  ;;  %v1887_v43 = vadd.f32 %v1821_v45, %v413_v36  ;;  %v2027_v47 = vadd.f32 (!%p2431_p12), %v3811_v55, %v1956_v49  ;;  %v1980_v7 = vld [vmem:[#allocation2 + $0xc0] sm:$0xff] (!%p2431_p12)  ;;  %v1982_v13 = vld [vmem:[#allocation2 + $0xd0] sm:$0xff] (!%p2431_p12) }
 0x29c   : > { %1948 = vst [vmem:[#allocation2 + $0x1e0] sm:$0xff] %v1884_v12  ;;  %v1885_v30 = vadd.f32 %v1813_v51, %v411_v38  ;;  %v2028_v53 = vadd.f32 (!%p2431_p12), %v3811_v55, %v1957_v52  ;;  %v2029_v19 = vadd.f32 (!%p2431_p12), %v3811_v55, %v1958_v26  ;;  %v2030_v61 = vadd.f32 (!%p2431_p12), %v3811_v55, %v1959_v28  ;;  %v1983_v40 = vld [vmem:[#allocation2 + $0xd8] sm:$0xff] (!%p2431_p12)  ;;  %v1984_v45 = vld [vmem:[#allocation2 + $0xe0] sm:$0xff] (!%p2431_p12)  ;;  %v1985_v12 = vld [vmem:[#allocation2 + $0xe8] sm:$0xff] (!%p2431_p12) }
 0x29d   : > { %1935 = vst [vmem:[#allocation2 + $0x178] sm:$0xff] %v1871_v48  ;;  %1951 = vst [vmem:[#allocation2 + $0x1f8] sm:$0xff] %v1887_v43  ;;  %v2031_v11 = vadd.f32 (!%p2431_p12), %v3811_v55, %v1960_v57  ;;  %v2032_v60 = vadd.f32 (!%p2431_p12), %v3811_v55, %v1961_v10  ;;  %v2033_v50 = vadd.f32 (!%p2431_p12), %v3811_v55, %v1962_v0  ;;  %v1986_v51 = vld [vmem:[#allocation2 + $0xf0] sm:$0xff] (!%p2431_p12)  ;;  %v1987_v48 = vld [vmem:[#allocation2 + $0xf8] sm:$0xff] (!%p2431_p12) }
 0x29e   : > { %1949 = vst [vmem:[#allocation2 + $0x1e8] sm:$0xff] %v1885_v30  ;;  %2091 = vst [vmem:[%s3462_s0] sm:$0xff] (!%p2431_p12), %v2027_v47  ;;  %v2034_v23 = vadd.f32 (!%p2431_p12), %v3811_v55, %v1963_v18  ;;  %v2035_v15 = vadd.f32 (!%p2431_p12), %v3811_v55, %v1964_v42  ;;  %v2036_v5 = vadd.f32 (!%p2431_p12), %v3811_v55, %v1965_v62  ;;  %v1988_v52 = vld [vmem:[#allocation2 + $0x100] sm:$0xff] (!%p2431_p12)  ;;  %v1989_v47 = vld [vmem:[#allocation2 + $0x108] sm:$0xff] (!%p2431_p12) }
 0x29f   : > { %2092 = vst [vmem:[%s3462_s0 + $0x8] sm:$0xff] %v2028_v53  ;;  %2093 = vst [vmem:[%s3462_s0 + $0x10] sm:$0xff] %v2029_v19  ;;  %v2037_v8 = vadd.f32 %v3811_v55, %v1966_v4  ;;  %v2038_v22 = vadd.f32 %v3811_v55, %v1967_v9  ;;  %v2039_v16 = vadd.f32 %v3811_v55, %v1968_v54  ;;  %v1990_v53 = vld [vmem:[#allocation2 + $0x110] sm:$0xff]  ;;  %v1991_v19 = vld [vmem:[#allocation2 + $0x118] sm:$0xff] }
 0x2a0   : > { %2094 = vst [vmem:[%s3462_s0 + $0x18] sm:$0xff] %v2030_v61  ;;  %2095 = vst [vmem:[%s3462_s0 + $0x20] sm:$0xff] %v2031_v11  ;;  %v2040_v14 = vadd.f32 %v3811_v55, %v1969_v17  ;;  %v2041_v44 = vadd.f32 %v3811_v55, %v1970_v46  ;;  %v2042_v24 = vadd.f32 %v3811_v55, %v1971_v20  ;;  %v1992_v61 = vld [vmem:[#allocation2 + $0x120] sm:$0xff]  ;;  %v1993_v11 = vld [vmem:[#allocation2 + $0x128] sm:$0xff] }
 0x2a1   : > { %2096 = vst [vmem:[%s3462_s0 + $0x28] sm:$0xff] %v2032_v60  ;;  %2097 = vst [vmem:[%s3462_s0 + $0x30] sm:$0xff] %v2033_v50  ;;  %v2043_v35 = vadd.f32 %v3811_v55, %v1972_v21  ;;  %v2044_v1 = vadd.f32 %v3811_v55, %v1973_v25  ;;  %v2045_v29 = vadd.f32 %v3811_v55, %v1974_v27  ;;  %v1994_v60 = vld [vmem:[#allocation2 + $0x130] sm:$0xff]  ;;  %v1995_v50 = vld [vmem:[#allocation2 + $0x138] sm:$0xff] }
 0x2a2   : > { %2098 = vst [vmem:[%s3462_s0 + $0x38] sm:$0xff] %v2034_v23  ;;  %2099 = vst [vmem:[%s3462_s0 + $0x40] sm:$0xff] %v2035_v15  ;;  %v2046_v56 = vadd.f32 %v3811_v55, %v1975_v3  ;;  %v2047_v58 = vadd.f32 %v3811_v55, %v1976_v59  ;;  %v2048_v32 = vadd.f32 %v3811_v55, %v1977_v39  ;;  %v1996_v23 = vld [vmem:[#allocation2 + $0x140] sm:$0xff]  ;;  %v1997_v15 = vld [vmem:[#allocation2 + $0x148] sm:$0xff] }
 0x2a3   : > { %2100 = vst [vmem:[%s3462_s0 + $0x48] sm:$0xff] %v2036_v5  ;;  %2101 = vst [vmem:[%s3462_s0 + $0x50] sm:$0xff] %v2037_v8  ;;  %v2049_v31 = vadd.f32 %v3811_v55, %v1978_v2  ;;  %v2050_v36 = vadd.f32 %v3811_v55, %v1979_v34  ;;  %v2051_v37 = vadd.f32 %v3811_v55, %v1980_v7  ;;  %v1998_v5 = vld [vmem:[#allocation2 + $0x150] sm:$0xff]  ;;  %v1999_v8 = vld [vmem:[#allocation2 + $0x158] sm:$0xff] }
 0x2a4   : > { %2102 = vst [vmem:[%s3462_s0 + $0x58] sm:$0xff] %v2038_v22  ;;  %2103 = vst [vmem:[%s3462_s0 + $0x60] sm:$0xff] %v2039_v16  ;;  %v2052_v63 = vadd.f32 %v3811_v55, %v1981_v33  ;;  %v2053_v41 = vadd.f32 %v3811_v55, %v1982_v13  ;;  %v2054_v38 = vadd.f32 %v3811_v55, %v1983_v40  ;;  %v2000_v22 = vld [vmem:[#allocation2 + $0x160] sm:$0xff]  ;;  %v2001_v16 = vld [vmem:[#allocation2 + $0x168] sm:$0xff] }
 0x2a5   : > { %2104 = vst [vmem:[%s3462_s0 + $0x68] sm:$0xff] %v2040_v14  ;;  %2105 = vst [vmem:[%s3462_s0 + $0x70] sm:$0xff] %v2041_v44  ;;  %v2055_v6 = vadd.f32 %v3811_v55, %v1984_v45  ;;  %v2056_v43 = vadd.f32 %v3811_v55, %v1985_v12  ;;  %v2057_v30 = vadd.f32 %v3811_v55, %v1986_v51  ;;  %v2002_v14 = vld [vmem:[#allocation2 + $0x170] sm:$0xff]  ;;  %v2003_v44 = vld [vmem:[#allocation2 + $0x178] sm:$0xff] }
 0x2a6   : > { %2106 = vst [vmem:[%s3462_s0 + $0x78] sm:$0xff] %v2042_v24  ;;  %2107 = vst [vmem:[%s3462_s0 + $0x80] sm:$0xff] %v2043_v35  ;;  %v2058_v49 = vadd.f32 %v3811_v55, %v1987_v48  ;;  %v2059_v26 = vadd.f32 %v3811_v55, %v1988_v52  ;;  %v2060_v28 = vadd.f32 %v3811_v55, %v1989_v47  ;;  %v2004_v24 = vld [vmem:[#allocation2 + $0x180] sm:$0xff]  ;;  %v2005_v35 = vld [vmem:[#allocation2 + $0x188] sm:$0xff] }
 0x2a7   : > { %2108 = vst [vmem:[%s3462_s0 + $0x88] sm:$0xff] %v2044_v1  ;;  %2109 = vst [vmem:[%s3462_s0 + $0x90] sm:$0xff] %v2045_v29  ;;  %v2061_v57 = vadd.f32 %v3811_v55, %v1990_v53  ;;  %v2062_v10 = vadd.f32 %v3811_v55, %v1991_v19  ;;  %v2063_v0 = vadd.f32 %v3811_v55, %v1992_v61  ;;  %v2006_v1 = vld [vmem:[#allocation2 + $0x190] sm:$0xff]  ;;  %v2007_v29 = vld [vmem:[#allocation2 + $0x198] sm:$0xff] }
 0x2a8   : > { %2110 = vst [vmem:[%s3462_s0 + $0x98] sm:$0xff] %v2046_v56  ;;  %2111 = vst [vmem:[%s3462_s0 + $0xa0] sm:$0xff] %v2047_v58  ;;  %v2064_v18 = vadd.f32 %v3811_v55, %v1993_v11  ;;  %v2065_v42 = vadd.f32 %v3811_v55, %v1994_v60  ;;  %v2066_v62 = vadd.f32 %v3811_v55, %v1995_v50  ;;  %v2008_v56 = vld [vmem:[#allocation2 + $0x1a0] sm:$0xff]  ;;  %v2009_v58 = vld [vmem:[#allocation2 + $0x1a8] sm:$0xff] }
 0x2a9   : > { %2112 = vst [vmem:[%s3462_s0 + $0xa8] sm:$0xff] %v2048_v32  ;;  %2113 = vst [vmem:[%s3462_s0 + $0xb0] sm:$0xff] %v2049_v31  ;;  %v2067_v4 = vadd.f32 %v3811_v55, %v1996_v23  ;;  %v2068_v9 = vadd.f32 %v3811_v55, %v1997_v15  ;;  %v2069_v54 = vadd.f32 %v3811_v55, %v1998_v5  ;;  %v2010_v32 = vld [vmem:[#allocation2 + $0x1b0] sm:$0xff]  ;;  %v2011_v31 = vld [vmem:[#allocation2 + $0x1b8] sm:$0xff] }
 0x2aa   : > { %2114 = vst [vmem:[%s3462_s0 + $0xb8] sm:$0xff] %v2050_v36  ;;  %2115 = vst [vmem:[%s3462_s0 + $0xc0] sm:$0xff] %v2051_v37  ;;  %v2070_v17 = vadd.f32 %v3811_v55, %v1999_v8  ;;  %v2071_v46 = vadd.f32 %v3811_v55, %v2000_v22  ;;  %v2072_v20 = vadd.f32 %v3811_v55, %v2001_v16  ;;  %v2012_v36 = vld [vmem:[#allocation2 + $0x1c0] sm:$0xff]  ;;  %v2013_v37 = vld [vmem:[#allocation2 + $0x1c8] sm:$0xff] }
 0x2ab   : > { %2116 = vst [vmem:[%s3462_s0 + $0xc8] sm:$0xff] %v2052_v63  ;;  %2117 = vst [vmem:[%s3462_s0 + $0xd0] sm:$0xff] %v2053_v41  ;;  %v2073_v21 = vadd.f32 %v3811_v55, %v2002_v14  ;;  %v2074_v25 = vadd.f32 %v3811_v55, %v2003_v44  ;;  %v2075_v27 = vadd.f32 %v3811_v55, %v2004_v24  ;;  %v2014_v63 = vld [vmem:[#allocation2 + $0x1d0] sm:$0xff]  ;;  %v2015_v41 = vld [vmem:[#allocation2 + $0x1d8] sm:$0xff] }
 0x2ac   : > { %2118 = vst [vmem:[%s3462_s0 + $0xd8] sm:$0xff] %v2054_v38  ;;  %2119 = vst [vmem:[%s3462_s0 + $0xe0] sm:$0xff] %v2055_v6  ;;  %v2076_v3 = vadd.f32 %v3811_v55, %v2005_v35  ;;  %v2077_v59 = vadd.f32 %v3811_v55, %v2006_v1  ;;  %v2078_v39 = vadd.f32 %v3811_v55, %v2007_v29  ;;  %v2016_v38 = vld [vmem:[#allocation2 + $0x1e0] sm:$0xff]  ;;  %v2017_v6 = vld [vmem:[#allocation2 + $0x1e8] sm:$0xff] }
 0x2ad   : > { %2120 = vst [vmem:[%s3462_s0 + $0xe8] sm:$0xff] %v2056_v43  ;;  %2121 = vst [vmem:[%s3462_s0 + $0xf0] sm:$0xff] %v2057_v30  ;;  %v2079_v2 = vadd.f32 %v3811_v55, %v2008_v56  ;;  %v2080_v34 = vadd.f32 %v3811_v55, %v2009_v58  ;;  %v2081_v7 = vadd.f32 %v3811_v55, %v2010_v32  ;;  %v2018_v43 = vld [vmem:[#allocation2 + $0x1f0] sm:$0xff]  ;;  %v2019_v30 = vld [vmem:[#allocation2 + $0x1f8] sm:$0xff] }
 0x2ae   : > { %2122 = vst [vmem:[%s3462_s0 + $0xf8] sm:$0xff] %v2058_v49  ;;  %2123 = vst [vmem:[%s3462_s0 + $0x100] sm:$0xff] %v2059_v26  ;;  %v2082_v33 = vadd.f32 %v3811_v55, %v2011_v31  ;;  %v2083_v13 = vadd.f32 %v3811_v55, %v2012_v36  ;;  %v2084_v40 = vadd.f32 %v3811_v55, %v2013_v37 }
 0x2af   : > { %2124 = vst [vmem:[%s3462_s0 + $0x108] sm:$0xff] %v2060_v28  ;;  %2125 = vst [vmem:[%s3462_s0 + $0x110] sm:$0xff] %v2061_v57  ;;  %v2085_v45 = vadd.f32 %v3811_v55, %v2014_v63  ;;  %v2086_v12 = vadd.f32 %v3811_v55, %v2015_v41  ;;  %v2087_v51 = vadd.f32 %v3811_v55, %v2016_v38 }
 0x2b0   : > { %2126 = vst [vmem:[%s3462_s0 + $0x118] sm:$0xff] %v2062_v10  ;;  %2127 = vst [vmem:[%s3462_s0 + $0x120] sm:$0xff] %v2063_v0  ;;  %v2088_v48 = vadd.f32 %v3811_v55, %v2017_v6  ;;  %v2089_v49 = vadd.f32 %v3811_v55, %v2018_v43  ;;  %v2090_v52 = vadd.f32 %v3811_v55, %v2019_v30 }
 0x2b1   : > { %2128 = vst [vmem:[%s3462_s0 + $0x128] sm:$0xff] %v2064_v18  ;;  %2129 = vst [vmem:[%s3462_s0 + $0x130] sm:$0xff] %v2065_v42 }
 0x2b2   : > { %2130 = vst [vmem:[%s3462_s0 + $0x138] sm:$0xff] %v2066_v62  ;;  %2131 = vst [vmem:[%s3462_s0 + $0x140] sm:$0xff] %v2067_v4 }
 0x2b3   : > { %2132 = vst [vmem:[%s3462_s0 + $0x148] sm:$0xff] %v2068_v9  ;;  %2133 = vst [vmem:[%s3462_s0 + $0x150] sm:$0xff] %v2069_v54 }
 0x2b4   : > { %2134 = vst [vmem:[%s3462_s0 + $0x158] sm:$0xff] %v2070_v17  ;;  %2135 = vst [vmem:[%s3462_s0 + $0x160] sm:$0xff] %v2071_v46 }
 0x2b5   : > { %2136 = vst [vmem:[%s3462_s0 + $0x168] sm:$0xff] %v2072_v20  ;;  %2137 = vst [vmem:[%s3462_s0 + $0x170] sm:$0xff] %v2073_v21 }
 0x2b6   : > { %2138 = vst [vmem:[%s3462_s0 + $0x178] sm:$0xff] %v2074_v25  ;;  %2139 = vst [vmem:[%s3462_s0 + $0x180] sm:$0xff] %v2075_v27 }
 0x2b7   : > { %2140 = vst [vmem:[%s3462_s0 + $0x188] sm:$0xff] %v2076_v3  ;;  %2141 = vst [vmem:[%s3462_s0 + $0x190] sm:$0xff] %v2077_v59 }
 0x2b8   : > { %2142 = vst [vmem:[%s3462_s0 + $0x198] sm:$0xff] %v2078_v39  ;;  %2143 = vst [vmem:[%s3462_s0 + $0x1a0] sm:$0xff] %v2079_v2 }
 0x2b9   : > { %2144 = vst [vmem:[%s3462_s0 + $0x1a8] sm:$0xff] %v2080_v34  ;;  %2145 = vst [vmem:[%s3462_s0 + $0x1b0] sm:$0xff] %v2081_v7 }
 0x2ba   : > { %2146 = vst [vmem:[%s3462_s0 + $0x1b8] sm:$0xff] %v2082_v33  ;;  %2147 = vst [vmem:[%s3462_s0 + $0x1c0] sm:$0xff] %v2083_v13 }
 0x2bb   : > { %2148 = vst [vmem:[%s3462_s0 + $0x1c8] sm:$0xff] %v2084_v40  ;;  %2149 = vst [vmem:[%s3462_s0 + $0x1d0] sm:$0xff] %v2085_v45 }
 0x2bc   : > { %2150 = vst [vmem:[%s3462_s0 + $0x1d8] sm:$0xff] %v2086_v12  ;;  %2151 = vst [vmem:[%s3462_s0 + $0x1e0] sm:$0xff] %v2087_v51 }
 0x2bd   : > { %2152 = vst [vmem:[%s3462_s0 + $0x1e8] sm:$0xff] %v2088_v48  ;;  %2153 = vst [vmem:[%s3462_s0 + $0x1f0] sm:$0xff] %v2089_v49 }
 0x2be   : > { %2154 = vst [vmem:[%s3462_s0 + $0x1f8] sm:$0xff] %v2090_v52 }
 0x2bf PF: > { %s4094_s16 = sld [smem:[#allocation18_spill]]  ;;  %s4096_s18 = sld [smem:[#allocation20_spill]] }
 0x2c0   : > { %s4097_s27 = sld [smem:[#allocation27_spill]]  ;;  %s2170_s9 = sshll.u32 %s3462_s0, 4  ;;  %s3948_s9 = int_to_ptr.vmem [resolvable:$true] %s2170_s9 }
 0x2c1   : > { %s3952_s22 = scalar_lea.sflag [#allocation5], %s274_s21  ;;  %s2988_s28 = scalar_lea.vmem %s3948_s9, 8192 }
 0x2c2   : > { %p2989_p0 = scmp.ne.s32.totalorder %s3948_s9, %s2988_s28  ;;  %s3154_s3 = smov [#allocation9]  }
 0x2c3   : > { %s2992_s2 = sshll.u32 %s3154_s3, 4  ;;  %s2993_s2 = int_to_ptr.vmem [resolvable:$false] %s2992_s2 }
 0x2c4   : > { %s2994_s10 = scalar_lea.vmem %s2993_s2, 16384  ;;  %p2995_p8 = scmp.lt.s32.totalorder %s3948_s9, %s2993_s2 }
 0x2c5   : > { %s2439_s11 = sshll.u32 %s4094_s16, 13  ;;  %p4098_p4 = scmp.ne.s32.totalorder %s4096_s18, 0 }
 0x2c6   : > { %s3945_s6 = scalar_lea.hbm %s4097_s27, %s2439_s11  ;;  %p2996_p6 = scmp.lt.s32.totalorder %s2994_s10, %s2988_s28 }
 0x2c7   : > { %p2990_p10 = pnand %p2989_p0, %p4098_p4 }
 0x2c8   : > { %p2997_p2 = por %p2996_p6, %p2995_p8 }
 0x2c9   : > { %p2991_p13 = pneg %p2990_p10 }
 0x2cb   : > { %p2998_p1 = pnand %p2997_p2, %p2991_p13 }
 0x2cd   : > { %3001 = shalt.err (!%p2998_p1)
}
 0x2ce   : > { %s3002_s15 = scalar_lea.hbm %s3945_s6, 8192  ;;  %s3006_s7 = scalar_lea.hbm %s4097_s27, 65536 }
 0x2cf   : > { %p3003_p9 = scmp.ne.s32.totalorder %s3945_s6, %s3002_s15  ;;  %p3007_p7 = scmp.lt.u32.totalorder %s3945_s6, %s4097_s27 }
 0x2d0   : > { %p3008_p11 = scmp.lt.u32.totalorder %s3006_s7, %s3002_s15  ;;  %p3010_p0 = scmp.lt.u32.totalorder %s3002_s15, %s3945_s6 }
 0x2d1   : > { %p3004_p3 = pnand %p3003_p9, %p4098_p4 }
 0x2d2   : > { %p3009_p12 = por %p3008_p11, %p3007_p7 }
 0x2d3   : > { %p3005_p5 = pneg %p3004_p3 }
 0x2d4   : > { %p3011_p10 = por %p3010_p0, %p3009_p12 }
 0x2d6   : > { %p3012_p13 = pnand %p3011_p10, %p3005_p5 }
 0x2d8   : > { %3015 = shalt.err (!%p3012_p13)
}
 0x2d9   : > { %s3155_s26 = smov 128   ;;  %s3156_s16 = smov 8  }
 0x2da   : > { %2605 = dma.vmem_to_hbm [thread:$0]  (%p4098_p4), %s3948_s9, 8192, %s3945_s6, %s3952_s22, %s3155_s26, %s3155_s26, %s3156_s16  }
 0x2db PF: > { %s4099_s29 = sld [smem:[#allocation14_spill]]  ;;  %s4100_s11 = sld [smem:[#allocation21_spill]] }
 0x2dc   : > { %p2625_p8 = scmp.ge.s32.totalorder %s3142_s25, 2 }
 0x2e1   : > { %s2185_s5 = sand.u32 1, %s4099_s29   ;;  %p4101_p6 = scmp.ne.s32.totalorder %s4100_s11, 0 }
 0x2e2   : > { %s2186_s12 = scalar_lea.sflag [#allocation5], %s2185_s5 }
 0x2e3   : > { %p2619_p2 = pnand %p2625_p8, %p4101_p6 }
 0x2e5   : > { %3085 = dma.done.wait (!%p2619_p2), %s2186_s12, 8192  }
 0x2e6   : > { %3087 = vsyncadd (!%p2619_p2), %s2186_s12, 4294959104  ;;  %s22_s25 = sadd.s32 1, %s3142_s25   ;;  %s4103_s12 = sld [smem:[#allocation15_spill]] }
 0x2e7   : > { %p3981_p1 = scmp.ge.s32.totalorder %s22_s25, 26   ;;  %s4104_s18 = smov %s3356_s13 }
 0x2e8   : > { %s4105_s15 = sld [smem:[#allocation16_spill]]  ;;  %s4106_s6 = sld [smem:[#allocation24_spill]] }
 0x2e9   : > { %s4107_s9 = sld [smem:[#allocation22_spill]]  ;;  %s4108_s3 = sld [smem:[#allocation23_spill]] }
 0x2ea   : > { %s4109_s13 = smov %s3098_s14  ;;  %s4110_s14 = smov %s4104_s18 }
 0x2eb   : > { %s4111_s16 = smov %s3110_s17  ;;  %s4113_s18 = smov %s3118_s19 }
 0x2ec   : > { %s4114_s19 = smov %s3122_s20  ;;  %s4115_s20 = smov %s3361_s30 }
 0x2ed   : > { %s4116_s21 = smov %s3134_s23  ;;  %s4117_s22 = smov %s3138_s24 }
 0x2ee   : > { %s4112_s17 = smov %s4106_s6  ;;  %21 = sbr.rel (!%p3981_p1) target bundleno = 16 (0x10), region = 103 }
 0x2ef   : > { %s4118_s23 = smov %s4107_s9  ;;  %s4119_s24 = smov %s4108_s3 }
 0x2f5   :  { %2191 = vsyncpa [#allocation4], 1 }
 0x2f6   :  { %2193 = vsyncpa [#allocation4 + $0x1], 1 }
 0x2f7   :  { %2194 = vsyncpa [#allocation7], 1 }
 0x2f8   :  { %2196 = vsyncpa [#allocation7 + $0x1], 1 }
 0x2f9   :  { %2197 = vsyncpa [#allocation5], 1 }
 0x2fa   :  { %2199 = vsyncpa [#allocation5 + $0x1], 1 }

</bundles_post_ra>
